<compile_context>
chip_gen: v5e
topology: v5e:2x2
jax: 0.10.0
libtpu: 0.0.40
codegen_flags: <defaults>
</compile_context>

<pallas_src>
import jax
import jax.numpy as jnp
import numpy as np
from jax.experimental import pallas as pl
from jax.experimental.pallas import tpu as pltpu


# ---------------------------------------------------------------------------
# 1-D bilinear interpolation matrix (align_corners=True), built at trace time
# ---------------------------------------------------------------------------
def _bilinear_matrix(out_size, in_size):
    """M (out,in) such that M @ x == 1-D bilinear resize, align_corners=True."""
    if in_size == 1:
        return jnp.ones((out_size, 1), jnp.float32)
    src = np.arange(out_size, dtype=np.float64) * (in_size - 1) / (out_size - 1)
    i0 = np.clip(np.floor(src).astype(np.int64), 0, in_size - 2)
    frac = (src - i0).astype(np.float32)
    m = np.zeros((out_size, in_size), np.float32)
    rows = np.arange(out_size)
    m[rows, i0] += 1.0 - frac
    m[rows, i0 + 1] += frac
    return jnp.asarray(m)


# ---------------------------------------------------------------------------
# Fused kernel: upsample + concat + pad + conv1 + ReLU + conv2 + ReLU
# ---------------------------------------------------------------------------
def _up_conv_kernel(skip_ref, lat_ref, mh_ref, mwt_ref, w1_ref, b1_ref,
                    w2_ref, b2_ref, o_ref, xpad, ypad):
    # Per grid step (= one image), everything channels-first:
    #   skip_ref: (1, Cs, Ho*Wo)   bf16   skip connection, NCHW flattened
    #   lat_ref : (1, Cl*H, W)     f32    latent (pre-upsample), NCHW flattened
    #   mh_ref  : (Ho, H)          f32    1-D row (height) upsample matrix
    #   mwt_ref : (W, Wo)          f32    1-D col (width) upsample matrix, transposed
    #   w1_ref  : (9, Cmid, Cin)   bf16   conv1 weights, per-tap (O, I) layout
    #   b1_ref  : (Cmid, 1)        f32
    #   w2_ref  : (9, Cout, Cmid)  bf16
    #   b2_ref  : (Cout, 1)        f32
    #   o_ref   : (1, Cout, Ho*Wo) f32
    # VMEM scratch (flat padded activations, bf16 = MXU input dtype):
    #   xpad : (Cin,  Ho*Wo + 2*(Wo+1))   conv1 input (skip ++ upsampled latent)
    #   ypad : (Cmid, Ho*Wo + 2*(Wo+1))   conv1 output / conv2 input
    _, Cs, HW = skip_ref.shape
    Ho, H = mh_ref.shape
    W, Wo = mwt_ref.shape
    Cl = lat_ref.shape[1] // H
    Cin = Cs + Cl
    Cmid = w1_ref.shape[1]
    Cout = w2_ref.shape[1]
    f32 = jnp.float32
    cdt = xpad.dtype                       # bf16 compute dtype for MXU operands
    q0 = Wo + 1                            # flat offset of image pixel (0, 0)
    flat = xpad.shape[1]                   # = HW + 2*q0

    # Flat padded indexing: pixel (i, j) lives at column q0 + i*Wo + j.  A 3x3
    # tap (dy, dx) is a contiguous lane-offset view shifted by (dy-1)*Wo+(dx-1).
    # Top/bottom halos land in the zeroed pads; the left/right column wrap-around
    # of dx != 1 taps is killed by a per-tap 0/1 mask on the matmul output.
    col = jax.lax.broadcasted_iota(jnp.int32, (1, HW), 1) % Wo
    not_left = (col != 0).astype(f32)          # valid mask for dx == 0 taps
    not_right = (col != Wo - 1).astype(f32)    # valid mask for dx == 2 taps

    # ---- zero only the halo pads (not the interiors; megacore-split safe) ---
    xpad[:, 0:q0] = jnp.zeros((Cin, q0), cdt)
    xpad[:, q0 + HW:flat] = jnp.zeros((Cin, q0), cdt)
    ypad[:, 0:q0] = jnp.zeros((Cmid, q0), cdt)
    ypad[:, q0 + HW:flat] = jnp.zeros((Cmid, q0), cdt)

    # ---- separable bilinear x2 upsample (align_corners=True), two matmuls ---
    lat2 = lat_ref[0]                                                # (Cl*H, W)
    ucol = jnp.dot(lat2, mwt_ref[...], preferred_element_type=f32)   # (Cl*H, Wo)
    v = ucol.reshape(Cl, H, Wo)                                      # lane dim kept
    mh_b = jnp.broadcast_to(mh_ref[...], (Cl, Ho, H))
    up = jnp.einsum('coh,chp->cop', mh_b, v,
                    preferred_element_type=f32)                      # (Cl, Ho, Wo)
    up = up.astype(cdt)

    # ---- concat([skip, upsample(latent)]) into the flat padded conv1 input --
    xpad[0:Cs, q0:q0 + HW] = skip_ref[0]            # one contiguous, lane-dense store
    # Upsampled latent is (Cl, Ho, Wo); the flat layout needs it one image row
    # at a time (Ho small static writes).  TODO(synk): fold into row-block tiling.
    for i in range(Ho):
        xpad[Cs:Cin, q0 + i * Wo:q0 + (i + 1) * Wo] = up[:, i, :]

    # ---- 3x3 conv as 9 shift-and-accumulate MXU matmuls ---------------------
    def conv3x3(src, w_ref, nout):
        acc = jnp.zeros((nout, HW), f32)
        for t in range(9):
            dy, dx = divmod(t, 3)
            start = q0 + (dy - 1) * Wo + (dx - 1)
            part = jnp.dot(w_ref[t], src[:, start:start + HW],       # bf16 x bf16
                           preferred_element_type=f32)               # f32 accumulate
            if dx == 0:
                part = part * not_left
            elif dx == 2:
                part = part * not_right
            acc = acc + part
        return acc

    h1 = jnp.maximum(conv3x3(xpad, w1_ref, Cmid) + b1_ref[...], 0.0)  # (Cmid, HW) f32
    ypad[:, q0:q0 + HW] = h1.astype(cdt)           # intermediate stays in VMEM
    h2 = jnp.maximum(conv3x3(ypad, w2_ref, Cout) + b2_ref[...], 0.0)  # (Cout, HW) f32
    o_ref[0] = h2


# ---------------------------------------------------------------------------
# Wrapper: NCHW kept end-to-end (no transposes), one fused pallas_call
# ---------------------------------------------------------------------------
def up_conv_forward(latent_nchw, skip_nchw, params):
    """Forward of up_conv(bilinear=True): double_conv(cat([skip, up(latent)]))."""
    N, Cl, H, W = latent_nchw.shape
    Ns, Cs, Ho, Wo = skip_nchw.shape
    assert Ns == N and Ho == 2 * H and Wo == 2 * W, "skip must be 2H x 2W"
    Cin = Cs + Cl
    Cmid = params['w1'].shape[1]
    Cout = params['w2'].shape[1]
    assert params['w1'].shape == (9, Cmid, Cin)
    assert params['w2'].shape == (9, Cout, Cmid)
    HW = Ho * Wo
    flat = HW + 2 * (Wo + 1)

    # Free reshapes + a bf16 cast only; no NCHW<->NHWC transposes anywhere.
    skip = skip_nchw.reshape(N, Cs, HW).astype(jnp.bfloat16)
    lat = latent_nchw.reshape(N, Cl * H, W)                  # small, stays f32

    mh = _bilinear_matrix(Ho, H)                             # (Ho, H)
    mwt = _bilinear_matrix(Wo, W).T                          # (W, Wo)
    b1 = params['b1'].reshape(Cmid, 1)
    b2 = params['b2'].reshape(Cout, 1)

    flops = N * (2 * Cl * H * W * Wo + 2 * Cl * Ho * H * Wo
                 + 2 * 9 * Cin * Cmid * HW + 2 * 9 * Cmid * Cout * HW)
    bytes_accessed = int(skip.size * 2 + lat.size * 4 + N * Cout * HW * 4
                         + params['w1'].size * 2 + params['w2'].size * 2
                         + (mh.size + mwt.size + b1.size + b2.size) * 4)

    out_flat = pl.pallas_call(
        _up_conv_kernel,
        out_shape=jax.ShapeDtypeStruct((N, Cout, HW), jnp.float32),
        grid=(N,),
        in_specs=[
            pl.BlockSpec((1, Cs, HW), lambda n: (n, 0, 0)),
            pl.BlockSpec((1, Cl * H, W), lambda n: (n, 0, 0)),
            pl.BlockSpec((Ho, H), lambda n: (0, 0)),
            pl.BlockSpec((W, Wo), lambda n: (0, 0)),
            pl.BlockSpec((9, Cmid, Cin), lambda n: (0, 0, 0)),
            pl.BlockSpec((Cmid, 1), lambda n: (0, 0)),
            pl.BlockSpec((9, Cout, Cmid), lambda n: (0, 0, 0)),
            pl.BlockSpec((Cout, 1), lambda n: (0, 0)),
        ],
        out_specs=pl.BlockSpec((1, Cout, HW), lambda n: (n, 0, 0)),
        scratch_shapes=[
            pltpu.VMEM((Cin, flat), jnp.bfloat16),
            pltpu.VMEM((Cmid, flat), jnp.bfloat16),
        ],
        compiler_params=pltpu.CompilerParams(
            dimension_semantics=("parallel",),
            vmem_limit_bytes=64 * 1024 * 1024),
        cost_estimate=pl.CostEstimate(flops=flops, transcendentals=0,
                                      bytes_accessed=bytes_accessed),
    )(skip, lat, mh, mwt, params['w1'], b1, params['w2'], b2)

    return out_flat.reshape(N, Cout, Ho, Wo)


# ---------------------------------------------------------------------------
# Parameters (stored pre-packed: per-tap (O, I) layout, bf16 for the MXU)
# ---------------------------------------------------------------------------
def init_params(key, in_channels, mid_channels, out_channels):
    k1, k2, k3, k4 = jax.random.split(key, 4)
    s1 = 1.0 / (in_channels * 9) ** 0.5
    s2 = 1.0 / (mid_channels * 9) ** 0.5
    w1 = jax.random.uniform(k1, (mid_channels, in_channels, 3, 3),
                            jnp.float32, -s1, s1)
    w2 = jax.random.uniform(k3, (out_channels, mid_channels, 3, 3),
                            jnp.float32, -s2, s2)

    def pack(w):  # (O, I, 3, 3) -> (9, O, I); from torch: same permute/reshape.
        o, i = w.shape[0], w.shape[1]
        return jnp.transpose(w, (2, 3, 0, 1)).reshape(9, o, i).astype(jnp.bfloat16)

    return {
        'w1': pack(w1),
        'b1': jax.random.uniform(k2, (mid_channels,), jnp.float32, -s1, s1),
        'w2': pack(w2),
        'b2': jax.random.uniform(k4, (out_channels,), jnp.float32, -s2, s2),
    }


# ---------------------------------------------------------------------------
# Pure-JAX/XLA reference for a correctness check
# ---------------------------------------------------------------------------
def up_conv_reference(latent_nchw, skip_nchw, params):
    _, _, H, W = latent_nchw.shape
    _, _, Ho, Wo = skip_nchw.shape
    Mh = _bilinear_matrix(Ho, H)
    Mw = _bilinear_matrix(Wo, W)
    up = jnp.einsum('oh,nchw->ncow', Mh, latent_nchw)
    up = jnp.einsum('pw,ncow->ncop', Mw, up)
    x = jnp.concatenate([skip_nchw, up], axis=1)

    def conv_relu(x, w9, b):
        o, i = w9.shape[1], w9.shape[2]
        w = jnp.transpose(w9.reshape(3, 3, o, i).astype(jnp.float32),
                          (2, 3, 0, 1))                       # OIHW
        y = jax.lax.conv_general_dilated(
            x, w, window_strides=(1, 1), padding='SAME',
            dimension_numbers=('NCHW', 'OIHW', 'NCHW'))
        return jax.nn.relu(y + b.reshape(1, -1, 1, 1))

    x = conv_relu(x, params['w1'], params['b1'])
    return conv_relu(x, params['w2'], params['b2'])


if __name__ == "__main__":
    key = jax.random.PRNGKey(0)
    k_lat, k_skip, k_par = jax.random.split(key, 3)

    # Small U-Net-like shapes:
    #   latent: (N=2, C=4, 8, 8), skip: (N=2, C=4, 16, 16)
    #   in_channels = 4 + 4 = 8, mid_channels = 8, out_channels = 4
    N, C_lat, H, W = 2, 4, 8, 8
    C_skip = 4
    in_channels = C_lat + C_skip
    mid_channels, out_channels = 8, 4

    latent = jax.random.normal(k_lat, (N, C_lat, H, W), jnp.float32)
    skip = jax.random.normal(k_skip, (N, C_skip, 2 * H, 2 * W), jnp.float32)
    params = init_params(k_par, in_channels, mid_channels, out_channels)

    out = jax.jit(up_conv_forward)(latent, skip, params)
    out = jax.block_until_ready(out)
    assert out.shape == (N, out_channels, 2 * H, 2 * W), out.shape

    ref = jax.block_until_ready(up_conv_reference(latent, skip, params))
    # bf16 MXU inputs with f32 accumulation -> slightly relaxed tolerance.
    np.testing.assert_allclose(np.asarray(out), np.asarray(ref),
                               rtol=3e-2, atol=3e-2)

    print("KERNEL_OK")
</pallas_src>

<mosaic_0001>
module attributes {stable_mosaic.version = 11 : i64} {
  func.func @_up_conv_kernel(%arg0: i32, %arg1: memref<1x4x256xbf16, #tpu.memory_space<vmem>>, %arg2: memref<1x32x8xf32, #tpu.memory_space<vmem>>, %arg3: memref<16x8xf32, #tpu.memory_space<vmem>>, %arg4: memref<8x16xf32, #tpu.memory_space<vmem>>, %arg5: memref<9x8x8xbf16, #tpu.memory_space<vmem>>, %arg6: memref<8x1xf32, #tpu.memory_space<vmem>>, %arg7: memref<9x4x8xbf16, #tpu.memory_space<vmem>>, %arg8: memref<4x1xf32, #tpu.memory_space<vmem>>, %arg9: memref<1x4x256xf32, #tpu.memory_space<vmem>>, %arg10: memref<8x290xbf16, #tpu.memory_space<vmem>>, %arg11: memref<8x290xbf16, #tpu.memory_space<vmem>>) attributes {dimension_semantics = [#tpu.dimension_semantics<parallel>], iteration_bounds = array<i64: 2>, scalar_prefetch = 0 : i64, scratch_operands = 2 : i64, tpu.core_type = #tpu.core_type<tc>, window_params = [{transform_indices = @transform_0, window_bounds = array<i64: 1, 4, 256>}, {transform_indices = @transform_1, window_bounds = array<i64: 1, 32, 8>}, {pipeline_mode = #tpu.pipeline_mode<synchronous>, transform_indices = @transform_2, window_bounds = array<i64: 16, 8>}, {pipeline_mode = #tpu.pipeline_mode<synchronous>, transform_indices = @transform_3, window_bounds = array<i64: 8, 16>}, {pipeline_mode = #tpu.pipeline_mode<synchronous>, transform_indices = @transform_4, window_bounds = array<i64: 9, 8, 8>}, {pipeline_mode = #tpu.pipeline_mode<synchronous>, transform_indices = @transform_5, window_bounds = array<i64: 8, 1>}, {pipeline_mode = #tpu.pipeline_mode<synchronous>, transform_indices = @transform_6, window_bounds = array<i64: 9, 4, 8>}, {pipeline_mode = #tpu.pipeline_mode<synchronous>, transform_indices = @transform_7, window_bounds = array<i64: 4, 1>}, {transform_indices = @transform_8, window_bounds = array<i64: 1, 4, 256>}]} {
    %0 = tpu.iota {dimensions = array<i32: 1>} : vector<1x256xi32>
    %c16_i32 = arith.constant 16 : i32
    %c0_i32 = arith.constant 0 : i32
    %1 = arith.cmpi eq, %c16_i32, %c0_i32 : i32
    %c1_i32 = arith.constant 1 : i32
    %2 = arith.select %1, %c1_i32, %c16_i32 : i32
    %3 = vector.broadcast %2 : i32 to vector<1x256xi32>
    %4 = arith.remsi %0, %3 : vector<1x256xi32>
    %c0_i32_0 = arith.constant 0 : i32
    %5 = vector.broadcast %c0_i32_0 : i32 to vector<1x256xi32>
    %6 = arith.cmpi ne, %4, %5 : vector<1x256xi32>
    %c0_i32_1 = arith.constant 0 : i32
    %7 = vector.broadcast %c0_i32_1 : i32 to vector<1x256xi32>
    %8 = arith.cmpi slt, %4, %7 : vector<1x256xi32>
    %c0_i32_2 = arith.constant 0 : i32
    %9 = arith.cmpi slt, %2, %c0_i32_2 : i32
    %10 = vector.broadcast %9 : i1 to vector<1x256xi1>
    %11 = vector.broadcast %10 : vector<1x256xi1> to vector<1x256xi1>
    %12 = arith.xori %8, %11 : vector<1x256xi1>
    %13 = arith.andi %12, %6 : vector<1x256xi1>
    %14 = vector.broadcast %2 : i32 to vector<1x256xi32>
    %15 = arith.addi %4, %14 : vector<1x256xi32>
    %16 = arith.select %13, %15, %4 : vector<1x256xi1>, vector<1x256xi32>
    %c0_i32_3 = arith.constant 0 : i32
    %17 = vector.broadcast %c0_i32_3 : i32 to vector<1x256xi32>
    %18 = arith.cmpi ne, %16, %17 : vector<1x256xi32>
    %19 = arith.extui %18 : vector<1x256xi1> to vector<1x256xi32>
    %20 = arith.sitofp %19 : vector<1x256xi32> to vector<1x256xf32>
    %c15_i32 = arith.constant 15 : i32
    %21 = vector.broadcast %c15_i32 : i32 to vector<1x256xi32>
    %22 = arith.cmpi ne, %16, %21 : vector<1x256xi32>
    %23 = arith.extui %22 : vector<1x256xi1> to vector<1x256xi32>
    %24 = arith.sitofp %23 : vector<1x256xi32> to vector<1x256xf32>
    %cst = arith.constant 0.000000e+00 : bf16
    %25 = vector.broadcast %cst : bf16 to vector<8x17xbf16>
    %c0 = arith.constant 0 : index
    %c0_4 = arith.constant 0 : index
    %26 = vector.load %arg10[%c0, %c0_4] : memref<8x290xbf16, #tpu.memory_space<vmem>>, vector<8x17xbf16>
    tpu.vector_store %arg10[%c0, %c0_4], %25 {strides = array<i32>} : memref<8x290xbf16, #tpu.memory_space<vmem>>, vector<8x17xbf16>,
    %cst_5 = arith.constant 0.000000e+00 : bf16
    %27 = vector.broadcast %cst_5 : bf16 to vector<8x17xbf16>
    %c0_6 = arith.constant 0 : index
    %c273 = arith.constant 273 : index
    %28 = vector.load %arg10[%c0_6, %c273] : memref<8x290xbf16, #tpu.memory_space<vmem>>, vector<8x17xbf16>
    tpu.vector_store %arg10[%c0_6, %c273], %27 {strides = array<i32>} : memref<8x290xbf16, #tpu.memory_space<vmem>>, vector<8x17xbf16>,
    %cst_7 = arith.constant 0.000000e+00 : bf16
    %29 = vector.broadcast %cst_7 : bf16 to vector<8x17xbf16>
    %c0_8 = arith.constant 0 : index
    %c0_9 = arith.constant 0 : index
    %30 = vector.load %arg11[%c0_8, %c0_9] : memref<8x290xbf16, #tpu.memory_space<vmem>>, vector<8x17xbf16>
    tpu.vector_store %arg11[%c0_8, %c0_9], %29 {strides = array<i32>} : memref<8x290xbf16, #tpu.memory_space<vmem>>, vector<8x17xbf16>,
    %cst_10 = arith.constant 0.000000e+00 : bf16
    %31 = vector.broadcast %cst_10 : bf16 to vector<8x17xbf16>
    %c0_11 = arith.constant 0 : index
    %c273_12 = arith.constant 273 : index
    %32 = vector.load %arg11[%c0_11, %c273_12] : memref<8x290xbf16, #tpu.memory_space<vmem>>, vector<8x17xbf16>
    tpu.vector_store %arg11[%c0_11, %c273_12], %31 {strides = array<i32>} : memref<8x290xbf16, #tpu.memory_space<vmem>>, vector<8x17xbf16>,
    %c0_13 = arith.constant 0 : index
    %c0_14 = arith.constant 0 : index
    %c0_15 = arith.constant 0 : index
    %33 = vector.load %arg2[%c0_13, %c0_14, %c0_15] : memref<1x32x8xf32, #tpu.memory_space<vmem>>, vector<1x32x8xf32>
    %34 = vector.shape_cast %33 : vector<1x32x8xf32> to vector<32x8xf32>
    %c0_16 = arith.constant 0 : index
    %c0_17 = arith.constant 0 : index
    %35 = vector.load %arg4[%c0_16, %c0_17] : memref<8x16xf32, #tpu.memory_space<vmem>>, vector<8x16xf32>
    %cst_18 = arith.constant dense<0.000000e+00> : vector<32x16xf32>
    %36 = tpu.matmul %34, %35, %cst_18 {dimension_numbers = #tpu.dot_dimension_numbers<[1], [0], [0], [1], [0, 0, 1, 1], [], []>} : vector<32x8xf32>, vector<8x16xf32>, vector<32x16xf32> -> vector<32x16xf32>
    %37 = vector.shape_cast %36 : vector<32x16xf32> to vector<4x8x16xf32>
    %c0_19 = arith.constant 0 : index
    %c0_20 = arith.constant 0 : index
    %38 = vector.load %arg3[%c0_19, %c0_20] : memref<16x8xf32, #tpu.memory_space<vmem>>, vector<16x8xf32>
    %39 = vector.shape_cast %38 : vector<16x8xf32> to vector<1x16x8xf32>
    %40 = vector.broadcast %39 : vector<1x16x8xf32> to vector<4x16x8xf32>
    "tpu.trace_start"() <{level = 10 : i32, message = "coh,chp->cop"}> : () -> ()
    %cst_21 = arith.constant dense<0.000000e+00> : vector<4x16x16xf32>
    %41 = tpu.matmul %40, %37, %cst_21 {dimension_numbers = #tpu.dot_dimension_numbers<[2], [1], [1], [2], [0, 0, 0, 1, 1, 2], [0], [0]>} : vector<4x16x8xf32>, vector<4x8x16xf32>, vector<4x16x16xf32> -> vector<4x16x16xf32>
    "tpu.trace_stop"() : () -> ()
    %42 = arith.truncf %41 : vector<4x16x16xf32> to vector<4x16x16xbf16>
    %c0_22 = arith.constant 0 : index
    %c0_23 = arith.constant 0 : index
    %c0_24 = arith.constant 0 : index
    %43 = vector.load %arg1[%c0_22, %c0_23, %c0_24] : memref<1x4x256xbf16, #tpu.memory_space<vmem>>, vector<1x4x256xbf16>
    %44 = vector.shape_cast %43 : vector<1x4x256xbf16> to vector<4x256xbf16>
    %c0_25 = arith.constant 0 : index
    %c17 = arith.constant 17 : index
    %45 = vector.load %arg10[%c0_25, %c17] : memref<8x290xbf16, #tpu.memory_space<vmem>>, vector<4x256xbf16>
    tpu.vector_store %arg10[%c0_25, %c17], %44 {strides = array<i32>} : memref<8x290xbf16, #tpu.memory_space<vmem>>, vector<4x256xbf16>,
    %46 = vector.extract_strided_slice %42 {offsets = [0, 0, 0], sizes = [4, 1, 16], strides = [1, 1, 1]} : vector<4x16x16xbf16> to vector<4x1x16xbf16>
    %47 = vector.shape_cast %46 : vector<4x1x16xbf16> to vector<4x16xbf16>
    %c4 = arith.constant 4 : index
    %c17_26 = arith.constant 17 : index
    %48 = vector.load %arg10[%c4, %c17_26] : memref<8x290xbf16, #tpu.memory_space<vmem>>, vector<4x16xbf16>
    tpu.vector_store %arg10[%c4, %c17_26], %47 {strides = array<i32>} : memref<8x290xbf16, #tpu.memory_space<vmem>>, vector<4x16xbf16>,
    %49 = vector.extract_strided_slice %42 {offsets = [0, 1, 0], sizes = [4, 1, 16], strides = [1, 1, 1]} : vector<4x16x16xbf16> to vector<4x1x16xbf16>
    %50 = vector.shape_cast %49 : vector<4x1x16xbf16> to vector<4x16xbf16>
    %c4_27 = arith.constant 4 : index
    %c33 = arith.constant 33 : index
    %51 = vector.load %arg10[%c4_27, %c33] : memref<8x290xbf16, #tpu.memory_space<vmem>>, vector<4x16xbf16>
    tpu.vector_store %arg10[%c4_27, %c33], %50 {strides = array<i32>} : memref<8x290xbf16, #tpu.memory_space<vmem>>, vector<4x16xbf16>,
    %52 = vector.extract_strided_slice %42 {offsets = [0, 2, 0], sizes = [4, 1, 16], strides = [1, 1, 1]} : vector<4x16x16xbf16> to vector<4x1x16xbf16>
    %53 = vector.shape_cast %52 : vector<4x1x16xbf16> to vector<4x16xbf16>
    %c4_28 = arith.constant 4 : index
    %c49 = arith.constant 49 : index
    %54 = vector.load %arg10[%c4_28, %c49] : memref<8x290xbf16, #tpu.memory_space<vmem>>, vector<4x16xbf16>
    tpu.vector_store %arg10[%c4_28, %c49], %53 {strides = array<i32>} : memref<8x290xbf16, #tpu.memory_space<vmem>>, vector<4x16xbf16>,
    %55 = vector.extract_strided_slice %42 {offsets = [0, 3, 0], sizes = [4, 1, 16], strides = [1, 1, 1]} : vector<4x16x16xbf16> to vector<4x1x16xbf16>
    %56 = vector.shape_cast %55 : vector<4x1x16xbf16> to vector<4x16xbf16>
    %c4_29 = arith.constant 4 : index
    %c65 = arith.constant 65 : index
    %57 = vector.load %arg10[%c4_29, %c65] : memref<8x290xbf16, #tpu.memory_space<vmem>>, vector<4x16xbf16>
    tpu.vector_store %arg10[%c4_29, %c65], %56 {strides = array<i32>} : memref<8x290xbf16, #tpu.memory_space<vmem>>, vector<4x16xbf16>,
    %58 = vector.extract_strided_slice %42 {offsets = [0, 4, 0], sizes = [4, 1, 16], strides = [1, 1, 1]} : vector<4x16x16xbf16> to vector<4x1x16xbf16>
    %59 = vector.shape_cast %58 : vector<4x1x16xbf16> to vector<4x16xbf16>
    %c4_30 = arith.constant 4 : index
    %c81 = arith.constant 81 : index
    %60 = vector.load %arg10[%c4_30, %c81] : memref<8x290xbf16, #tpu.memory_space<vmem>>, vector<4x16xbf16>
    tpu.vector_store %arg10[%c4_30, %c81], %59 {strides = array<i32>} : memref<8x290xbf16, #tpu.memory_space<vmem>>, vector<4x16xbf16>,
    %61 = vector.extract_strided_slice %42 {offsets = [0, 5, 0], sizes = [4, 1, 16], strides = [1, 1, 1]} : vector<4x16x16xbf16> to vector<4x1x16xbf16>
    %62 = vector.shape_cast %61 : vector<4x1x16xbf16> to vector<4x16xbf16>
    %c4_31 = arith.constant 4 : index
    %c97 = arith.constant 97 : index
    %63 = vector.load %arg10[%c4_31, %c97] : memref<8x290xbf16, #tpu.memory_space<vmem>>, vector<4x16xbf16>
    tpu.vector_store %arg10[%c4_31, %c97], %62 {strides = array<i32>} : memref<8x290xbf16, #tpu.memory_space<vmem>>, vector<4x16xbf16>,
    %64 = vector.extract_strided_slice %42 {offsets = [0, 6, 0], sizes = [4, 1, 16], strides = [1, 1, 1]} : vector<4x16x16xbf16> to vector<4x1x16xbf16>
    %65 = vector.shape_cast %64 : vector<4x1x16xbf16> to vector<4x16xbf16>
    %c4_32 = arith.constant 4 : index
    %c113 = arith.constant 113 : index
    %66 = vector.load %arg10[%c4_32, %c113] : memref<8x290xbf16, #tpu.memory_space<vmem>>, vector<4x16xbf16>
    tpu.vector_store %arg10[%c4_32, %c113], %65 {strides = array<i32>} : memref<8x290xbf16, #tpu.memory_space<vmem>>, vector<4x16xbf16>,
    %67 = vector.extract_strided_slice %42 {offsets = [0, 7, 0], sizes = [4, 1, 16], strides = [1, 1, 1]} : vector<4x16x16xbf16> to vector<4x1x16xbf16>
    %68 = vector.shape_cast %67 : vector<4x1x16xbf16> to vector<4x16xbf16>
    %c4_33 = arith.constant 4 : index
    %c129 = arith.constant 129 : index
    %69 = vector.load %arg10[%c4_33, %c129] : memref<8x290xbf16, #tpu.memory_space<vmem>>, vector<4x16xbf16>
    tpu.vector_store %arg10[%c4_33, %c129], %68 {strides = array<i32>} : memref<8x290xbf16, #tpu.memory_space<vmem>>, vector<4x16xbf16>,
    %70 = vector.extract_strided_slice %42 {offsets = [0, 8, 0], sizes = [4, 1, 16], strides = [1, 1, 1]} : vector<4x16x16xbf16> to vector<4x1x16xbf16>
    %71 = vector.shape_cast %70 : vector<4x1x16xbf16> to vector<4x16xbf16>
    %c4_34 = arith.constant 4 : index
    %c145 = arith.constant 145 : index
    %72 = vector.load %arg10[%c4_34, %c145] : memref<8x290xbf16, #tpu.memory_space<vmem>>, vector<4x16xbf16>
    tpu.vector_store %arg10[%c4_34, %c145], %71 {strides = array<i32>} : memref<8x290xbf16, #tpu.memory_space<vmem>>, vector<4x16xbf16>,
    %73 = vector.extract_strided_slice %42 {offsets = [0, 9, 0], sizes = [4, 1, 16], strides = [1, 1, 1]} : vector<4x16x16xbf16> to vector<4x1x16xbf16>
    %74 = vector.shape_cast %73 : vector<4x1x16xbf16> to vector<4x16xbf16>
    %c4_35 = arith.constant 4 : index
    %c161 = arith.constant 161 : index
    %75 = vector.load %arg10[%c4_35, %c161] : memref<8x290xbf16, #tpu.memory_space<vmem>>, vector<4x16xbf16>
    tpu.vector_store %arg10[%c4_35, %c161], %74 {strides = array<i32>} : memref<8x290xbf16, #tpu.memory_space<vmem>>, vector<4x16xbf16>,
    %76 = vector.extract_strided_slice %42 {offsets = [0, 10, 0], sizes = [4, 1, 16], strides = [1, 1, 1]} : vector<4x16x16xbf16> to vector<4x1x16xbf16>
    %77 = vector.shape_cast %76 : vector<4x1x16xbf16> to vector<4x16xbf16>
    %c4_36 = arith.constant 4 : index
    %c177 = arith.constant 177 : index
    %78 = vector.load %arg10[%c4_36, %c177] : memref<8x290xbf16, #tpu.memory_space<vmem>>, vector<4x16xbf16>
    tpu.vector_store %arg10[%c4_36, %c177], %77 {strides = array<i32>} : memref<8x290xbf16, #tpu.memory_space<vmem>>, vector<4x16xbf16>,
    %79 = vector.extract_strided_slice %42 {offsets = [0, 11, 0], sizes = [4, 1, 16], strides = [1, 1, 1]} : vector<4x16x16xbf16> to vector<4x1x16xbf16>
    %80 = vector.shape_cast %79 : vector<4x1x16xbf16> to vector<4x16xbf16>
    %c4_37 = arith.constant 4 : index
    %c193 = arith.constant 193 : index
    %81 = vector.load %arg10[%c4_37, %c193] : memref<8x290xbf16, #tpu.memory_space<vmem>>, vector<4x16xbf16>
    tpu.vector_store %arg10[%c4_37, %c193], %80 {strides = array<i32>} : memref<8x290xbf16, #tpu.memory_space<vmem>>, vector<4x16xbf16>,
    %82 = vector.extract_strided_slice %42 {offsets = [0, 12, 0], sizes = [4, 1, 16], strides = [1, 1, 1]} : vector<4x16x16xbf16> to vector<4x1x16xbf16>
    %83 = vector.shape_cast %82 : vector<4x1x16xbf16> to vector<4x16xbf16>
    %c4_38 = arith.constant 4 : index
    %c209 = arith.constant 209 : index
    %84 = vector.load %arg10[%c4_38, %c209] : memref<8x290xbf16, #tpu.memory_space<vmem>>, vector<4x16xbf16>
    tpu.vector_store %arg10[%c4_38, %c209], %83 {strides = array<i32>} : memref<8x290xbf16, #tpu.memory_space<vmem>>, vector<4x16xbf16>,
    %85 = vector.extract_strided_slice %42 {offsets = [0, 13, 0], sizes = [4, 1, 16], strides = [1, 1, 1]} : vector<4x16x16xbf16> to vector<4x1x16xbf16>
    %86 = vector.shape_cast %85 : vector<4x1x16xbf16> to vector<4x16xbf16>
    %c4_39 = arith.constant 4 : index
    %c225 = arith.constant 225 : index
    %87 = vector.load %arg10[%c4_39, %c225] : memref<8x290xbf16, #tpu.memory_space<vmem>>, vector<4x16xbf16>
    tpu.vector_store %arg10[%c4_39, %c225], %86 {strides = array<i32>} : memref<8x290xbf16, #tpu.memory_space<vmem>>, vector<4x16xbf16>,
    %88 = vector.extract_strided_slice %42 {offsets = [0, 14, 0], sizes = [4, 1, 16], strides = [1, 1, 1]} : vector<4x16x16xbf16> to vector<4x1x16xbf16>
    %89 = vector.shape_cast %88 : vector<4x1x16xbf16> to vector<4x16xbf16>
    %c4_40 = arith.constant 4 : index
    %c241 = arith.constant 241 : index
    %90 = vector.load %arg10[%c4_40, %c241] : memref<8x290xbf16, #tpu.memory_space<vmem>>, vector<4x16xbf16>
    tpu.vector_store %arg10[%c4_40, %c241], %89 {strides = array<i32>} : memref<8x290xbf16, #tpu.memory_space<vmem>>, vector<4x16xbf16>,
    %91 = vector.extract_strided_slice %42 {offsets = [0, 15, 0], sizes = [4, 1, 16], strides = [1, 1, 1]} : vector<4x16x16xbf16> to vector<4x1x16xbf16>
    %92 = vector.shape_cast %91 : vector<4x1x16xbf16> to vector<4x16xbf16>
    %c4_41 = arith.constant 4 : index
    %c257 = arith.constant 257 : index
    %93 = vector.load %arg10[%c4_41, %c257] : memref<8x290xbf16, #tpu.memory_space<vmem>>, vector<4x16xbf16>
    tpu.vector_store %arg10[%c4_41, %c257], %92 {strides = array<i32>} : memref<8x290xbf16, #tpu.memory_space<vmem>>, vector<4x16xbf16>,
    %cst_42 = arith.constant 0.000000e+00 : f32
    %94 = vector.broadcast %cst_42 : f32 to vector<8x256xf32>
    %c0_43 = arith.constant 0 : index
    %c0_44 = arith.constant 0 : index
    %c0_45 = arith.constant 0 : index
    %95 = vector.load %arg5[%c0_43, %c0_44, %c0_45] : memref<9x8x8xbf16, #tpu.memory_space<vmem>>, vector<1x8x8xbf16>
    %96 = vector.shape_cast %95 : vector<1x8x8xbf16> to vector<8x8xbf16>
    %c0_46 = arith.constant 0 : index
    %c0_47 = arith.constant 0 : index
    %97 = vector.load %arg10[%c0_46, %c0_47] : memref<8x290xbf16, #tpu.memory_space<vmem>>, vector<8x256xbf16>
    %cst_48 = arith.constant dense<0.000000e+00> : vector<8x256xf32>
    %98 = tpu.matmul %96, %97, %cst_48 {dimension_numbers = #tpu.dot_dimension_numbers<[1], [0], [0], [1], [0, 0, 1, 1], [], []>} : vector<8x8xbf16>, vector<8x256xbf16>, vector<8x256xf32> -> vector<8x256xf32>
    %99 = vector.broadcast %20 : vector<1x256xf32> to vector<8x256xf32>
    %100 = arith.mulf %98, %99 : vector<8x256xf32>
    %101 = arith.addf %94, %100 : vector<8x256xf32>
    %c1 = arith.constant 1 : index
    %c0_49 = arith.constant 0 : index
    %c0_50 = arith.constant 0 : index
    %102 = vector.load %arg5[%c1, %c0_49, %c0_50] : memref<9x8x8xbf16, #tpu.memory_space<vmem>>, vector<1x8x8xbf16>
    %103 = vector.shape_cast %102 : vector<1x8x8xbf16> to vector<8x8xbf16>
    %c0_51 = arith.constant 0 : index
    %c1_52 = arith.constant 1 : index
    %104 = vector.load %arg10[%c0_51, %c1_52] : memref<8x290xbf16, #tpu.memory_space<vmem>>, vector<8x256xbf16>
    %cst_53 = arith.constant dense<0.000000e+00> : vector<8x256xf32>
    %105 = tpu.matmul %103, %104, %cst_53 {dimension_numbers = #tpu.dot_dimension_numbers<[1], [0], [0], [1], [0, 0, 1, 1], [], []>} : vector<8x8xbf16>, vector<8x256xbf16>, vector<8x256xf32> -> vector<8x256xf32>
    %106 = arith.addf %101, %105 : vector<8x256xf32>
    %c2 = arith.constant 2 : index
    %c0_54 = arith.constant 0 : index
    %c0_55 = arith.constant 0 : index
    %107 = vector.load %arg5[%c2, %c0_54, %c0_55] : memref<9x8x8xbf16, #tpu.memory_space<vmem>>, vector<1x8x8xbf16>
    %108 = vector.shape_cast %107 : vector<1x8x8xbf16> to vector<8x8xbf16>
    %c0_56 = arith.constant 0 : index
    %c2_57 = arith.constant 2 : index
    %109 = vector.load %arg10[%c0_56, %c2_57] : memref<8x290xbf16, #tpu.memory_space<vmem>>, vector<8x256xbf16>
    %cst_58 = arith.constant dense<0.000000e+00> : vector<8x256xf32>
    %110 = tpu.matmul %108, %109, %cst_58 {dimension_numbers = #tpu.dot_dimension_numbers<[1], [0], [0], [1], [0, 0, 1, 1], [], []>} : vector<8x8xbf16>, vector<8x256xbf16>, vector<8x256xf32> -> vector<8x256xf32>
    %111 = vector.broadcast %24 : vector<1x256xf32> to vector<8x256xf32>
    %112 = arith.mulf %110, %111 : vector<8x256xf32>
    %113 = arith.addf %106, %112 : vector<8x256xf32>
    %c3 = arith.constant 3 : index
    %c0_59 = arith.constant 0 : index
    %c0_60 = arith.constant 0 : index
    %114 = vector.load %arg5[%c3, %c0_59, %c0_60] : memref<9x8x8xbf16, #tpu.memory_space<vmem>>, vector<1x8x8xbf16>
    %115 = vector.shape_cast %114 : vector<1x8x8xbf16> to vector<8x8xbf16>
    %c0_61 = arith.constant 0 : index
    %c16 = arith.constant 16 : index
    %116 = vector.load %arg10[%c0_61, %c16] : memref<8x290xbf16, #tpu.memory_space<vmem>>, vector<8x256xbf16>
    %cst_62 = arith.constant dense<0.000000e+00> : vector<8x256xf32>
    %117 = tpu.matmul %115, %116, %cst_62 {dimension_numbers = #tpu.dot_dimension_numbers<[1], [0], [0], [1], [0, 0, 1, 1], [], []>} : vector<8x8xbf16>, vector<8x256xbf16>, vector<8x256xf32> -> vector<8x256xf32>
    %118 = vector.broadcast %20 : vector<1x256xf32> to vector<8x256xf32>
    %119 = arith.mulf %117, %118 : vector<8x256xf32>
    %120 = arith.addf %113, %119 : vector<8x256xf32>
    %c4_63 = arith.constant 4 : index
    %c0_64 = arith.constant 0 : index
    %c0_65 = arith.constant 0 : index
    %121 = vector.load %arg5[%c4_63, %c0_64, %c0_65] : memref<9x8x8xbf16, #tpu.memory_space<vmem>>, vector<1x8x8xbf16>
    %122 = vector.shape_cast %121 : vector<1x8x8xbf16> to vector<8x8xbf16>
    %c0_66 = arith.constant 0 : index
    %c17_67 = arith.constant 17 : index
    %123 = vector.load %arg10[%c0_66, %c17_67] : memref<8x290xbf16, #tpu.memory_space<vmem>>, vector<8x256xbf16>
    %cst_68 = arith.constant dense<0.000000e+00> : vector<8x256xf32>
    %124 = tpu.matmul %122, %123, %cst_68 {dimension_numbers = #tpu.dot_dimension_numbers<[1], [0], [0], [1], [0, 0, 1, 1], [], []>} : vector<8x8xbf16>, vector<8x256xbf16>, vector<8x256xf32> -> vector<8x256xf32>
    %125 = arith.addf %120, %124 : vector<8x256xf32>
    %c5 = arith.constant 5 : index
    %c0_69 = arith.constant 0 : index
    %c0_70 = arith.constant 0 : index
    %126 = vector.load %arg5[%c5, %c0_69, %c0_70] : memref<9x8x8xbf16, #tpu.memory_space<vmem>>, vector<1x8x8xbf16>
    %127 = vector.shape_cast %126 : vector<1x8x8xbf16> to vector<8x8xbf16>
    %c0_71 = arith.constant 0 : index
    %c18 = arith.constant 18 : index
    %128 = vector.load %arg10[%c0_71, %c18] : memref<8x290xbf16, #tpu.memory_space<vmem>>, vector<8x256xbf16>
    %cst_72 = arith.constant dense<0.000000e+00> : vector<8x256xf32>
    %129 = tpu.matmul %127, %128, %cst_72 {dimension_numbers = #tpu.dot_dimension_numbers<[1], [0], [0], [1], [0, 0, 1, 1], [], []>} : vector<8x8xbf16>, vector<8x256xbf16>, vector<8x256xf32> -> vector<8x256xf32>
    %130 = vector.broadcast %24 : vector<1x256xf32> to vector<8x256xf32>
    %131 = arith.mulf %129, %130 : vector<8x256xf32>
    %132 = arith.addf %125, %131 : vector<8x256xf32>
    %c6 = arith.constant 6 : index
    %c0_73 = arith.constant 0 : index
    %c0_74 = arith.constant 0 : index
    %133 = vector.load %arg5[%c6, %c0_73, %c0_74] : memref<9x8x8xbf16, #tpu.memory_space<vmem>>, vector<1x8x8xbf16>
    %134 = vector.shape_cast %133 : vector<1x8x8xbf16> to vector<8x8xbf16>
    %c0_75 = arith.constant 0 : index
    %c32 = arith.constant 32 : index
    %135 = vector.load %arg10[%c0_75, %c32] : memref<8x290xbf16, #tpu.memory_space<vmem>>, vector<8x256xbf16>
    %cst_76 = arith.constant dense<0.000000e+00> : vector<8x256xf32>
    %136 = tpu.matmul %134, %135, %cst_76 {dimension_numbers = #tpu.dot_dimension_numbers<[1], [0], [0], [1], [0, 0, 1, 1], [], []>} : vector<8x8xbf16>, vector<8x256xbf16>, vector<8x256xf32> -> vector<8x256xf32>
    %137 = vector.broadcast %20 : vector<1x256xf32> to vector<8x256xf32>
    %138 = arith.mulf %136, %137 : vector<8x256xf32>
    %139 = arith.addf %132, %138 : vector<8x256xf32>
    %c7 = arith.constant 7 : index
    %c0_77 = arith.constant 0 : index
    %c0_78 = arith.constant 0 : index
    %140 = vector.load %arg5[%c7, %c0_77, %c0_78] : memref<9x8x8xbf16, #tpu.memory_space<vmem>>, vector<1x8x8xbf16>
    %141 = vector.shape_cast %140 : vector<1x8x8xbf16> to vector<8x8xbf16>
    %c0_79 = arith.constant 0 : index
    %c33_80 = arith.constant 33 : index
    %142 = vector.load %arg10[%c0_79, %c33_80] : memref<8x290xbf16, #tpu.memory_space<vmem>>, vector<8x256xbf16>
    %cst_81 = arith.constant dense<0.000000e+00> : vector<8x256xf32>
    %143 = tpu.matmul %141, %142, %cst_81 {dimension_numbers = #tpu.dot_dimension_numbers<[1], [0], [0], [1], [0, 0, 1, 1], [], []>} : vector<8x8xbf16>, vector<8x256xbf16>, vector<8x256xf32> -> vector<8x256xf32>
    %144 = arith.addf %139, %143 : vector<8x256xf32>
    %c8 = arith.constant 8 : index
    %c0_82 = arith.constant 0 : index
    %c0_83 = arith.constant 0 : index
    %145 = vector.load %arg5[%c8, %c0_82, %c0_83] : memref<9x8x8xbf16, #tpu.memory_space<vmem>>, vector<1x8x8xbf16>
    %146 = vector.shape_cast %145 : vector<1x8x8xbf16> to vector<8x8xbf16>
    %c0_84 = arith.constant 0 : index
    %c34 = arith.constant 34 : index
    %147 = vector.load %arg10[%c0_84, %c34] : memref<8x290xbf16, #tpu.memory_space<vmem>>, vector<8x256xbf16>
    %cst_85 = arith.constant dense<0.000000e+00> : vector<8x256xf32>
    %148 = tpu.matmul %146, %147, %cst_85 {dimension_numbers = #tpu.dot_dimension_numbers<[1], [0], [0], [1], [0, 0, 1, 1], [], []>} : vector<8x8xbf16>, vector<8x256xbf16>, vector<8x256xf32> -> vector<8x256xf32>
    %149 = vector.broadcast %24 : vector<1x256xf32> to vector<8x256xf32>
    %150 = arith.mulf %148, %149 : vector<8x256xf32>
    %151 = arith.addf %144, %150 : vector<8x256xf32>
    %c0_86 = arith.constant 0 : index
    %c0_87 = arith.constant 0 : index
    %152 = vector.load %arg6[%c0_86, %c0_87] : memref<8x1xf32, #tpu.memory_space<vmem>>, vector<8x1xf32>
    %153 = vector.broadcast %152 : vector<8x1xf32> to vector<8x256xf32>
    %154 = arith.addf %151, %153 : vector<8x256xf32>
    %cst_88 = arith.constant 0.000000e+00 : f32
    %155 = vector.broadcast %cst_88 : f32 to vector<8x256xf32>
    %156 = arith.maximumf %154, %155 : vector<8x256xf32>
    %157 = arith.truncf %156 : vector<8x256xf32> to vector<8x256xbf16>
    %c0_89 = arith.constant 0 : index
    %c17_90 = arith.constant 17 : index
    %158 = vector.load %arg11[%c0_89, %c17_90] : memref<8x290xbf16, #tpu.memory_space<vmem>>, vector<8x256xbf16>
    tpu.vector_store %arg11[%c0_89, %c17_90], %157 {strides = array<i32>} : memref<8x290xbf16, #tpu.memory_space<vmem>>, vector<8x256xbf16>,
    %cst_91 = arith.constant 0.000000e+00 : f32
    %159 = vector.broadcast %cst_91 : f32 to vector<4x256xf32>
    %c0_92 = arith.constant 0 : index
    %c0_93 = arith.constant 0 : index
    %c0_94 = arith.constant 0 : index
    %160 = vector.load %arg7[%c0_92, %c0_93, %c0_94] : memref<9x4x8xbf16, #tpu.memory_space<vmem>>, vector<1x4x8xbf16>
    %161 = vector.shape_cast %160 : vector<1x4x8xbf16> to vector<4x8xbf16>
    %c0_95 = arith.constant 0 : index
    %c0_96 = arith.constant 0 : index
    %162 = vector.load %arg11[%c0_95, %c0_96] : memref<8x290xbf16, #tpu.memory_space<vmem>>, vector<8x256xbf16>
    %cst_97 = arith.constant dense<0.000000e+00> : vector<4x256xf32>
    %163 = tpu.matmul %161, %162, %cst_97 {dimension_numbers = #tpu.dot_dimension_numbers<[1], [0], [0], [1], [0, 0, 1, 1], [], []>} : vector<4x8xbf16>, vector<8x256xbf16>, vector<4x256xf32> -> vector<4x256xf32>
    %164 = vector.broadcast %20 : vector<1x256xf32> to vector<4x256xf32>
    %165 = arith.mulf %163, %164 : vector<4x256xf32>
    %166 = arith.addf %159, %165 : vector<4x256xf32>
    %c1_98 = arith.constant 1 : index
    %c0_99 = arith.constant 0 : index
    %c0_100 = arith.constant 0 : index
    %167 = vector.load %arg7[%c1_98, %c0_99, %c0_100] : memref<9x4x8xbf16, #tpu.memory_space<vmem>>, vector<1x4x8xbf16>
    %168 = vector.shape_cast %167 : vector<1x4x8xbf16> to vector<4x8xbf16>
    %c0_101 = arith.constant 0 : index
    %c1_102 = arith.constant 1 : index
    %169 = vector.load %arg11[%c0_101, %c1_102] : memref<8x290xbf16, #tpu.memory_space<vmem>>, vector<8x256xbf16>
    %cst_103 = arith.constant dense<0.000000e+00> : vector<4x256xf32>
    %170 = tpu.matmul %168, %169, %cst_103 {dimension_numbers = #tpu.dot_dimension_numbers<[1], [0], [0], [1], [0, 0, 1, 1], [], []>} : vector<4x8xbf16>, vector<8x256xbf16>, vector<4x256xf32> -> vector<4x256xf32>
    %171 = arith.addf %166, %170 : vector<4x256xf32>
    %c2_104 = arith.constant 2 : index
    %c0_105 = arith.constant 0 : index
    %c0_106 = arith.constant 0 : index
    %172 = vector.load %arg7[%c2_104, %c0_105, %c0_106] : memref<9x4x8xbf16, #tpu.memory_space<vmem>>, vector<1x4x8xbf16>
    %173 = vector.shape_cast %172 : vector<1x4x8xbf16> to vector<4x8xbf16>
    %c0_107 = arith.constant 0 : index
    %c2_108 = arith.constant 2 : index
    %174 = vector.load %arg11[%c0_107, %c2_108] : memref<8x290xbf16, #tpu.memory_space<vmem>>, vector<8x256xbf16>
    %cst_109 = arith.constant dense<0.000000e+00> : vector<4x256xf32>
    %175 = tpu.matmul %173, %174, %cst_109 {dimension_numbers = #tpu.dot_dimension_numbers<[1], [0], [0], [1], [0, 0, 1, 1], [], []>} : vector<4x8xbf16>, vector<8x256xbf16>, vector<4x256xf32> -> vector<4x256xf32>
    %176 = vector.broadcast %24 : vector<1x256xf32> to vector<4x256xf32>
    %177 = arith.mulf %175, %176 : vector<4x256xf32>
    %178 = arith.addf %171, %177 : vector<4x256xf32>
    %c3_110 = arith.constant 3 : index
    %c0_111 = arith.constant 0 : index
    %c0_112 = arith.constant 0 : index
    %179 = vector.load %arg7[%c3_110, %c0_111, %c0_112] : memref<9x4x8xbf16, #tpu.memory_space<vmem>>, vector<1x4x8xbf16>
    %180 = vector.shape_cast %179 : vector<1x4x8xbf16> to vector<4x8xbf16>
    %c0_113 = arith.constant 0 : index
    %c16_114 = arith.constant 16 : index
    %181 = vector.load %arg11[%c0_113, %c16_114] : memref<8x290xbf16, #tpu.memory_space<vmem>>, vector<8x256xbf16>
    %cst_115 = arith.constant dense<0.000000e+00> : vector<4x256xf32>
    %182 = tpu.matmul %180, %181, %cst_115 {dimension_numbers = #tpu.dot_dimension_numbers<[1], [0], [0], [1], [0, 0, 1, 1], [], []>} : vector<4x8xbf16>, vector<8x256xbf16>, vector<4x256xf32> -> vector<4x256xf32>
    %183 = vector.broadcast %20 : vector<1x256xf32> to vector<4x256xf32>
    %184 = arith.mulf %182, %183 : vector<4x256xf32>
    %185 = arith.addf %178, %184 : vector<4x256xf32>
    %c4_116 = arith.constant 4 : index
    %c0_117 = arith.constant 0 : index
    %c0_118 = arith.constant 0 : index
    %186 = vector.load %arg7[%c4_116, %c0_117, %c0_118] : memref<9x4x8xbf16, #tpu.memory_space<vmem>>, vector<1x4x8xbf16>
    %187 = vector.shape_cast %186 : vector<1x4x8xbf16> to vector<4x8xbf16>
    %c0_119 = arith.constant 0 : index
    %c17_120 = arith.constant 17 : index
    %188 = vector.load %arg11[%c0_119, %c17_120] : memref<8x290xbf16, #tpu.memory_space<vmem>>, vector<8x256xbf16>
    %cst_121 = arith.constant dense<0.000000e+00> : vector<4x256xf32>
    %189 = tpu.matmul %187, %188, %cst_121 {dimension_numbers = #tpu.dot_dimension_numbers<[1], [0], [0], [1], [0, 0, 1, 1], [], []>} : vector<4x8xbf16>, vector<8x256xbf16>, vector<4x256xf32> -> vector<4x256xf32>
    %190 = arith.addf %185, %189 : vector<4x256xf32>
    %c5_122 = arith.constant 5 : index
    %c0_123 = arith.constant 0 : index
    %c0_124 = arith.constant 0 : index
    %191 = vector.load %arg7[%c5_122, %c0_123, %c0_124] : memref<9x4x8xbf16, #tpu.memory_space<vmem>>, vector<1x4x8xbf16>
    %192 = vector.shape_cast %191 : vector<1x4x8xbf16> to vector<4x8xbf16>
    %c0_125 = arith.constant 0 : index
    %c18_126 = arith.constant 18 : index
    %193 = vector.load %arg11[%c0_125, %c18_126] : memref<8x290xbf16, #tpu.memory_space<vmem>>, vector<8x256xbf16>
    %cst_127 = arith.constant dense<0.000000e+00> : vector<4x256xf32>
    %194 = tpu.matmul %192, %193, %cst_127 {dimension_numbers = #tpu.dot_dimension_numbers<[1], [0], [0], [1], [0, 0, 1, 1], [], []>} : vector<4x8xbf16>, vector<8x256xbf16>, vector<4x256xf32> -> vector<4x256xf32>
    %195 = vector.broadcast %24 : vector<1x256xf32> to vector<4x256xf32>
    %196 = arith.mulf %194, %195 : vector<4x256xf32>
    %197 = arith.addf %190, %196 : vector<4x256xf32>
    %c6_128 = arith.constant 6 : index
    %c0_129 = arith.constant 0 : index
    %c0_130 = arith.constant 0 : index
    %198 = vector.load %arg7[%c6_128, %c0_129, %c0_130] : memref<9x4x8xbf16, #tpu.memory_space<vmem>>, vector<1x4x8xbf16>
    %199 = vector.shape_cast %198 : vector<1x4x8xbf16> to vector<4x8xbf16>
    %c0_131 = arith.constant 0 : index
    %c32_132 = arith.constant 32 : index
    %200 = vector.load %arg11[%c0_131, %c32_132] : memref<8x290xbf16, #tpu.memory_space<vmem>>, vector<8x256xbf16>
    %cst_133 = arith.constant dense<0.000000e+00> : vector<4x256xf32>
    %201 = tpu.matmul %199, %200, %cst_133 {dimension_numbers = #tpu.dot_dimension_numbers<[1], [0], [0], [1], [0, 0, 1, 1], [], []>} : vector<4x8xbf16>, vector<8x256xbf16>, vector<4x256xf32> -> vector<4x256xf32>
    %202 = vector.broadcast %20 : vector<1x256xf32> to vector<4x256xf32>
    %203 = arith.mulf %201, %202 : vector<4x256xf32>
    %204 = arith.addf %197, %203 : vector<4x256xf32>
    %c7_134 = arith.constant 7 : index
    %c0_135 = arith.constant 0 : index
    %c0_136 = arith.constant 0 : index
    %205 = vector.load %arg7[%c7_134, %c0_135, %c0_136] : memref<9x4x8xbf16, #tpu.memory_space<vmem>>, vector<1x4x8xbf16>
    %206 = vector.shape_cast %205 : vector<1x4x8xbf16> to vector<4x8xbf16>
    %c0_137 = arith.constant 0 : index
    %c33_138 = arith.constant 33 : index
    %207 = vector.load %arg11[%c0_137, %c33_138] : memref<8x290xbf16, #tpu.memory_space<vmem>>, vector<8x256xbf16>
    %cst_139 = arith.constant dense<0.000000e+00> : vector<4x256xf32>
    %208 = tpu.matmul %206, %207, %cst_139 {dimension_numbers = #tpu.dot_dimension_numbers<[1], [0], [0], [1], [0, 0, 1, 1], [], []>} : vector<4x8xbf16>, vector<8x256xbf16>, vector<4x256xf32> -> vector<4x256xf32>
    %209 = arith.addf %204, %208 : vector<4x256xf32>
    %c8_140 = arith.constant 8 : index
    %c0_141 = arith.constant 0 : index
    %c0_142 = arith.constant 0 : index
    %210 = vector.load %arg7[%c8_140, %c0_141, %c0_142] : memref<9x4x8xbf16, #tpu.memory_space<vmem>>, vector<1x4x8xbf16>
    %211 = vector.shape_cast %210 : vector<1x4x8xbf16> to vector<4x8xbf16>
    %c0_143 = arith.constant 0 : index
    %c34_144 = arith.constant 34 : index
    %212 = vector.load %arg11[%c0_143, %c34_144] : memref<8x290xbf16, #tpu.memory_space<vmem>>, vector<8x256xbf16>
    %cst_145 = arith.constant dense<0.000000e+00> : vector<4x256xf32>
    %213 = tpu.matmul %211, %212, %cst_145 {dimension_numbers = #tpu.dot_dimension_numbers<[1], [0], [0], [1], [0, 0, 1, 1], [], []>} : vector<4x8xbf16>, vector<8x256xbf16>, vector<4x256xf32> -> vector<4x256xf32>
    %214 = vector.broadcast %24 : vector<1x256xf32> to vector<4x256xf32>
    %215 = arith.mulf %213, %214 : vector<4x256xf32>
    %216 = arith.addf %209, %215 : vector<4x256xf32>
    %c0_146 = arith.constant 0 : index
    %c0_147 = arith.constant 0 : index
    %217 = vector.load %arg8[%c0_146, %c0_147] : memref<4x1xf32, #tpu.memory_space<vmem>>, vector<4x1xf32>
    %218 = vector.broadcast %217 : vector<4x1xf32> to vector<4x256xf32>
    %219 = arith.addf %216, %218 : vector<4x256xf32>
    %cst_148 = arith.constant 0.000000e+00 : f32
    %220 = vector.broadcast %cst_148 : f32 to vector<4x256xf32>
    %221 = arith.maximumf %219, %220 : vector<4x256xf32>
    %c0_149 = arith.constant 0 : index
    %c0_150 = arith.constant 0 : index
    %c0_151 = arith.constant 0 : index
    %222 = vector.load %arg9[%c0_149, %c0_150, %c0_151] : memref<1x4x256xf32, #tpu.memory_space<vmem>>, vector<1x4x256xf32>
    %223 = vector.shape_cast %222 : vector<1x4x256xf32> to vector<4x256xf32>
    %224 = vector.shape_cast %221 : vector<4x256xf32> to vector<1x4x256xf32>
    tpu.vector_store %arg9[%c0_149, %c0_150, %c0_151], %224 {strides = array<i32>} : memref<1x4x256xf32, #tpu.memory_space<vmem>>, vector<1x4x256xf32>,
    return
  }
  func.func @transform_0(%arg0: i32) -> (i32, i32, i32) {
    %c0_i32 = arith.constant 0 : i32
    %c0_i32_0 = arith.constant 0 : i32
    %c0_i32_1 = arith.constant 0 : i32
    return %arg0, %c0_i32, %c0_i32_0 : i32, i32, i32
  }
  func.func @transform_1(%arg0: i32) -> (i32, i32, i32) {
    %c0_i32 = arith.constant 0 : i32
    %c0_i32_0 = arith.constant 0 : i32
    %c0_i32_1 = arith.constant 0 : i32
    return %arg0, %c0_i32, %c0_i32_0 : i32, i32, i32
  }
  func.func @transform_2(%arg0: i32) -> (i32, i32) {
    %c0_i32 = arith.constant 0 : i32
    %c0_i32_0 = arith.constant 0 : i32
    %c0_i32_1 = arith.constant 0 : i32
    return %c0_i32, %c0_i32_0 : i32, i32
  }
  func.func @transform_3(%arg0: i32) -> (i32, i32) {
    %c0_i32 = arith.constant 0 : i32
    %c0_i32_0 = arith.constant 0 : i32
    %c0_i32_1 = arith.constant 0 : i32
    return %c0_i32, %c0_i32_0 : i32, i32
  }
  func.func @transform_4(%arg0: i32) -> (i32, i32, i32) {
    %c0_i32 = arith.constant 0 : i32
    %c0_i32_0 = arith.constant 0 : i32
    %c0_i32_1 = arith.constant 0 : i32
    %c0_i32_2 = arith.constant 0 : i32
    return %c0_i32, %c0_i32_0, %c0_i32_1 : i32, i32, i32
  }
  func.func @transform_5(%arg0: i32) -> (i32, i32) {
    %c0_i32 = arith.constant 0 : i32
    %c0_i32_0 = arith.constant 0 : i32
    %c0_i32_1 = arith.constant 0 : i32
    return %c0_i32, %c0_i32_0 : i32, i32
  }
  func.func @transform_6(%arg0: i32) -> (i32, i32, i32) {
    %c0_i32 = arith.constant 0 : i32
    %c0_i32_0 = arith.constant 0 : i32
    %c0_i32_1 = arith.constant 0 : i32
    %c0_i32_2 = arith.constant 0 : i32
    return %c0_i32, %c0_i32_0, %c0_i32_1 : i32, i32, i32
  }
  func.func @transform_7(%arg0: i32) -> (i32, i32) {
    %c0_i32 = arith.constant 0 : i32
    %c0_i32_0 = arith.constant 0 : i32
    %c0_i32_1 = arith.constant 0 : i32
    return %c0_i32, %c0_i32_0 : i32, i32
  }
  func.func @transform_8(%arg0: i32) -> (i32, i32, i32) {
    %c0_i32 = arith.constant 0 : i32
    %c0_i32_0 = arith.constant 0 : i32
    %c0_i32_1 = arith.constant 0 : i32
    return %arg0, %c0_i32, %c0_i32_0 : i32, i32, i32
  }
}

</mosaic_0001>

<bundles_post_ra>
// kernel: up_conv_forward.1
= control target key start
LH: loop header
LB: loop body
LE: loop exit
PB: predicated region body
PF: predicated region fallthrough
CT: control target
= control target key end

     0   :  { %s1948_s27 = smov 0   ;;  %s2414_s0 = inlined_call_operand.vmem [shape: bf16[2,4,256], index: 0, kind: input, shape index: {}]   ;;  %s2415_s1 = inlined_call_operand.vmem [shape: f32[2,32,8], index: 1, kind: input, shape index: {}]   ;;  %s2416_s2 = inlined_call_operand.vmem [shape: f32[16,8], index: 2, kind: input, shape index: {}]   ;;  %s2417_s3 = inlined_call_operand.vmem [shape: f32[8,16], index: 3, kind: input, shape index: {}]   ;;  %s2418_s4 = inlined_call_operand.vmem [shape: bf16[9,8,8], index: 4, kind: input, shape index: {}]   ;;  %s2419_s5 = inlined_call_operand.vmem [shape: f32[8,1], index: 5, kind: input, shape index: {}]   ;;  %s2420_s6 = inlined_call_operand.vmem [shape: bf16[9,4,8], index: 6, kind: input, shape index: {}]   ;;  %s2421_s7 = inlined_call_operand.vmem [shape: f32[4,1], index: 7, kind: input, shape index: {}]   ;;  %s2422_s8 = inlined_call_operand.vmem [shape: f32[2,4,256], index: 8, kind: output, shape index: {}]  }
   0x1 LB: > { %s1762_s28 = sadd.s32 4294967295, %s1883_s27   ;;  %p1766_p0 = scmp.ge.s32.totalorder %s1883_s27, 1  ;;  %s1883_s27 = sphi %s1948_s27, %s18_s27  }
   0x2   : > { %p272_p1 = scmp.lt.s32.totalorder %s1883_s27, 3 }
   0x4   : > { %p273_p2 = pnand %p1766_p0, %p272_p1 }
   0x5   : > { %p311_p3 = scmp.lt.s32.totalorder (!%p273_p2), %s1762_s28, 1  ;;  %s1885_s21 = smov (!%p273_p2), 17  }
   0x6   : > { %276 = sbr.rel (%p273_p2) target bundleno = 1226 (0x4ca), region = 52  ;;  %s1886_s22 = smov (!%p273_p2), 113  }
   0x7   : > { %s1887_s23 = smov (!%p273_p2), 49   ;;  %s1888_s24 = smov (!%p273_p2), 81  }
   0x8   : > { %s1889_s25 = smov (!%p273_p2), 33   ;;  %s1890_s26 = smov (!%p273_p2), 65  }
   0x9   : > { %s1891_s29 = smov (!%p273_p2), 97   ;;  %s1892_s30 = smov (!%p273_p2), 1  }
   0xa   : > { %s1896_s11 = smov (!%p273_p2), 111   ;;  %s1897_s12 = smov (!%p273_p2), 112  }
   0xb   : > { %v376_v0 = vld [vmem:[%s2417_s3] sm:$0xff]  ;;  %s2426_s28 = smov (!%p311_p3, %s1762_s28), 1  ;;  %vm377_vm0 = vcmask 64512   ;;  %v420_v6 = vld [vmem:[%s2416_s2 + $0x8] sm:$0xff]  ;;  %vm555_vm1 = vcmask 1045509   ;;  %vm558_vm2 = vcmask 1046534  }
   0xc   : > { %405 = vmatpush.msra.mxu0 %v376_v0  ;;  %1846 = vmatpush.msra.mxu2 %v376_v0  ;;  %s1843_s9 = sshll.u32 %s2426_s28, 2  ;;  %s1844_s10 = sshll.u32 %s2426_s28, 5  ;;  %v419_v8 = vld [vmem:[%s2416_s2] sm:$0xff]  ;;  %vm561_vm3 = vcmask 1047559   ;;  %vm366_vm4 = vcmask 134144   ;;  %vm368_vm5 = vcmask 273544  }
   0xd   : > { %s315_s13 = scalar_lea.vmem %s2414_s0, %s1843_s9  ;;  %s320_s16 = scalar_lea.vmem %s2415_s1, %s1844_s10  ;;  %vm539_vm6 = vcmask 1041544   ;;  %vm540_vm7 = vcmask 1045508   ;;  %vm535_vm8 = vcmask 138240   ;;  %vm543_vm9 = vcmask 132096  }
   0xe   : > { %v372_v1 = vld [vmem:[%s320_s16] sm:$0xff]  ;;  %v375_v3 = vld [vmem:[%s320_s16 + $0x18] sm:$0xff]  ;;  %v373_v4 = vld [vmem:[%s320_s16 + $0x8] sm:$0xff]  ;;  %vm567_vm11 = vcmask 265354   ;;  %vm580_vm12 = vcmask 396554   ;;  %vm593_vm13 = vcmask 527754  }
   0xf   : > { %v527_v2 = vld [vmem:[%s315_s13] sm:$0xf]  ;;  %1777 = vmatmul.msk.f32.vlgmr.msra.gmra.mxu0 %vm377_vm0, %v372_v1  ;;  %1780 = vmatmul.msk.f32.vlgmr.msra.gmra.mxu2 %vm377_vm0, %v375_v3  ;;  %v374_v5 = vld [vmem:[%s320_s16 + $0x10] sm:$0xff]  ;;  %vm541_vm10 = vmor %vm540_vm7, %vm539_vm6  ;;  %vm606_vm14 = vcmask 658954   ;;  %vm618_vm15 = vcmask 790154   ;;  %vm659_vm7 = vcmask 134154  }
  0x10   : > { %529 = vst [vmem:[#allocation1] ss:$2 sm:$0xff] %v527_v2  ;;  %s1894_s9 = smov 126   ;;  %s1895_s10 = smov 127  }
  0x11   : > { %s1898_s13 = smov 96   ;;  %s1899_s14 = smov 110  }
  0x12   : > { %s1900_s15 = smov 94   ;;  %s1901_s16 = smov 95  }
  0x17   : > { %1778 = vmatmul.msk.f32.gmra.mxu0 %vm377_vm0, %v373_v4  ;;  %v530_v12 = vld.sshfl [vmem:[#allocation1] sm:$0xff pattern:$0x75643120] }
  0x18   : > { %532 = vrot.lane.b32.xlu1 %v530_v12, %s1885_s21 }
  0x1f   : > { %1779 = vmatmul.msk.f32.gmra.mxu0 %vm377_vm0, %v374_v5 }
  0x8c   : > { %v407_v7 = vpop.f32.mrf.mxu0 }
  0x8d   : > { %442 = vmatpush.msra.mxu1 %v407_v7  ;;  %1847 = vmatpush.msra.mxu3 %v407_v7 }
  0x8e   : > { %1782 = vmatmul.msk.f32.vlgmr.msra.gmra.mxu3 %vm377_vm0, %v420_v6  ;;  %1781 = vmatmul.msk.f32.vlgmr.msra.gmra.mxu1 %vm377_vm0, %v419_v8 }
  0x92   : > { %v416_v9 = vpop.f32.mrf.mxu2 }
  0x93   : > { %511 = vmatpush.msrb.mxu1 %v416_v9 }
  0x94   : > { %v410_v10 = vpop.f32.mrf.mxu0 }
  0x95   : > { %465 = vmatpush.msrb.mxu2 %v410_v10 }
  0x96   : > { %1783 = vmatmul.msk.f32.vlgmr.msrb.gmra.mxu2 %vm377_vm0, %v419_v8  ;;  %1787 = vmatmul.msk.f32.vlgmr.msrb.gmra.mxu1 %vm377_vm0, %v419_v8 }
  0x9c   : > { %v413_v11 = vpop.f32.mrf.mxu0 }
  0x9d   : > { %488 = vmatpush.msrb.mxu3 %v413_v11 }
  0x9e   : > { %1784 = vmatmul.msk.f32.gmra.mxu2 %vm377_vm0, %v420_v6  ;;  %1785 = vmatmul.msk.f32.vlgmr.msrb.gmra.mxu3 %vm377_vm0, %v419_v8 }
  0x9f   : > { %1788 = vmatmul.msk.f32.gmra.mxu1 %vm377_vm0, %v420_v6 }
  0xa6   : > { %1786 = vmatmul.msk.f32.gmra.mxu3 %vm377_vm0, %v420_v6 }
 0x10b   : > { %v444_v13 = vpop.f32.mrf.mxu1 }
 0x10c   : > { %v519_v16 = vpack.c.bf16 %v444_v13, %v444_v13 }
 0x10e   : > { %v1988_v20 = vunpack.c.l.b16 %v519_v16 }
 0x110   : > { %v632_v24 = vrot.slane %v1988_v20, 2  ;;  %v553_v27 = vrot.slane %v1988_v20, 4  ;;  %v582_v28 = vrot.slane %v1988_v20, 6  ;;  %v569_v29 = vrot.slane %v1988_v20, 5 }
 0x111   : > { %v447_v14 = vpop.f32.mrf.mxu3  ;;  %v595_v34 = vrot.slane %v1988_v20, 7  ;;  %v620_v16 = vrot.slane %v1988_v20, 1 }
 0x112   : > { %v520_v22 = vpack.c.bf16 %v447_v14, %v447_v14 }
 0x113   : > { %v513_v15 = vpop.f32.mrf.mxu1 }
 0x114   : > { %v525_v19 = vpack.c.bf16 %v513_v15, %v513_v15  ;;  %v1999_v30 = vunpack.c.l.b16 %v520_v22 }
 0x116   : > { %v1992_v23 = vunpack.c.l.b16 %v525_v19  ;;  %v669_v14 = vrot.slane %v1999_v30, 4 }
 0x118   : > { %v636_v33 = vrot.slane %v1992_v23, 7  ;;  %v560_v36 = vrot.slane %v1992_v23, 1  ;;  %v587_v38 = vrot.slane %v1992_v23, 3  ;;  %v612_v41 = vrot.slane %v1992_v23, 5 }
 0x119   : > { %v467_v17 = vpop.f32.mrf.mxu2  ;;  %v574_v42 = vrot.slane %v1992_v23, 2  ;;  %v600_v8 = vrot.slane %v1992_v23, 4 }
 0x11a   : > { %v521_v18 = vpack.c.bf16 %v467_v17, %v467_v17  ;;  %v649_v17 = vrot.slane %v1988_v20, 3 }
 0x11c   : > { %v1990_v21 = vunpack.c.l.b16 %v521_v18  ;;  %v516_v55 = vpop.f32.mrf.mxu1 }
 0x11d   : > { %v526_v5 = vpack.c.bf16 %v516_v55, %v516_v55 }
 0x11e   : > { %v633_v26 = vrot.slane %v1990_v21, 1  ;;  %v554_v35 = vrot.slane %v1990_v21, 3  ;;  %v583_v37 = vrot.slane %v1990_v21, 5  ;;  %v608_v40 = vrot.slane %v1990_v21, 7 }
 0x11f   : > { %v570_v45 = vrot.slane %v1990_v21, 4  ;;  %v596_v46 = vrot.slane %v1990_v21, 6  ;;  %v2050_v18 = vunpack.c.l.b16 %v526_v5 }
 0x120   : > { %v634_v44 = vsel %vm555_vm1, %v633_v26, %v632_v24  ;;  %v556_v52 = vsel %vm555_vm1, %v554_v35, %v553_v27  ;;  %v584_v53 = vsel %vm555_vm1, %v583_v37, %v582_v28  ;;  %v609_v0 = vsel %vm555_vm1, %v608_v40, %v1988_v20 }
 0x121   : > { %v490_v25 = vpop.f32.mrf.mxu3  ;;  %v470_v31 = vpop.f32.mrf.mxu2  ;;  %v571_v6 = vsel %vm555_vm1, %v570_v45, %v569_v29  ;;  %v597_v7 = vsel %vm555_vm1, %v596_v46, %v595_v34  ;;  %v650_v24 = vrot.slane %v1990_v21, 2  ;;  %v674_v29 = vrot.slane %v2050_v18, 1 }
 0x122   : > { %v523_v32 = vpack.c.bf16 %v490_v25, %v490_v25  ;;  %v522_v43 = vpack.c.bf16 %v470_v31, %v470_v31  ;;  %v624_v34 = vrot.slane %v1992_v23, 6 }
 0x123   : > { %v651_v35 = vsel %vm555_vm1, %v650_v24, %v649_v17 }
 0x124   : > { %v2007_v39 = vunpack.c.l.b16 %v523_v32  ;;  %v2027_v60 = vunpack.c.l.b16 %v522_v43 }
 0x126   : > { %v635_v47 = vsel %vm558_vm2, %v2007_v39, %v634_v44  ;;  %v557_v48 = vrot.slane %v2007_v39, 2  ;;  %v585_v49 = vrot.slane %v2007_v39, 4  ;;  %v610_v50 = vrot.slane %v2007_v39, 6 }
 0x127   : > { %v637_v51 = vsel %vm561_vm3, %v636_v33, %v635_v47  ;;  %v572_v54 = vrot.slane %v2007_v39, 3  ;;  %v598_v59 = vrot.slane %v2007_v39, 5  ;;  %v670_v13 = vrot.slane %v2027_v60, 3 }
 0x128   : > { %v638_v56 = vpack.c.b16 %v637_v51, %v637_v51  ;;  %v559_v57 = vsel %vm558_vm2, %v557_v48, %v556_v52  ;;  %v586_v58 = vsel %vm558_vm2, %v585_v49, %v584_v53  ;;  %v611_v4 = vsel %vm558_vm2, %v610_v50, %v609_v0 }
 0x129   : > { %v493_v61 = vpop.f32.mrf.mxu3  ;;  %v562_v62 = vsel %vm561_vm3, %v560_v36, %v559_v57  ;;  %v588_v63 = vsel %vm561_vm3, %v587_v38, %v586_v58  ;;  %v573_v10 = vsel %vm558_vm2, %v572_v54, %v571_v6  ;;  %v599_v11 = vsel %vm558_vm2, %v598_v59, %v597_v7 }
 0x12a   : > { %v524_v1 = vpack.c.bf16 %v493_v61, %v493_v61  ;;  %639 = vrot.lane.b32.xlu2 %v638_v56, %s1886_s22  ;;  %v563_v2 = vpack.c.b16 %v562_v62, %v562_v62  ;;  %v589_v3 = vpack.c.b16 %v588_v63, %v588_v63  ;;  %v613_v12 = vsel %vm561_vm3, %v612_v41, %v611_v4 }
 0x12b   : > { %v575_v19 = vsel %vm561_vm3, %v574_v42, %v573_v10  ;;  %v601_v22 = vsel %vm561_vm3, %v600_v8, %v599_v11  ;;  %v614_v25 = vpack.c.b16 %v613_v12, %v613_v12  ;;  %v622_v26 = vrot.slane %v2007_v39, 7 }
 0x12c   : > { %v2038_v9 = vunpack.c.l.b16 %v524_v1  ;;  %564 = vrot.lane.b32.xlu0 %v563_v2, %s1885_s21  ;;  %590 = vrot.lane.b32.xlu1 %v589_v3, %s1887_s23  ;;  %v652_v27 = vrot.slane %v2007_v39, 1  ;;  %v671_v28 = vsel %vm555_vm1, %v670_v13, %v669_v14  ;;  %v576_v20 = vpack.c.b16 %v575_v19, %v575_v19 }
 0x12d   : > { %v602_v31 = vpack.c.b16 %v601_v22, %v601_v22  ;;  %v621_v33 = vsel %vm555_vm1, %v1990_v21, %v620_v16  ;;  %v706_v39 = vrot.slane %v2027_v60, 6  ;;  %v705_v21 = vrot.slane %v1999_v30, 7 }
 0x12e   : > { %v672_v15 = vrot.slane %v2038_v9, 2  ;;  %v623_v36 = vsel %vm558_vm2, %v622_v26, %v621_v33  ;;  %v653_v37 = vsel %vm558_vm2, %v652_v27, %v651_v35  ;;  %v708_v40 = vrot.slane %v2038_v9, 5 }
 0x12f   : > { %v625_v41 = vsel %vm561_vm3, %v624_v34, %v623_v36  ;;  %v654_v42 = vsel %vm561_vm3, %v1992_v23, %v653_v37  ;;  %v740_v43 = vrot.slane %v2027_v60, 1  ;;  %v694_v44 = vrot.slane %v2027_v60, 5 }
 0x130   : > { %v673_v32 = vsel %vm558_vm2, %v672_v15, %v671_v28  ;;  %v696_v46 = vrot.slane %v2038_v9, 4  ;;  %v707_v47 = vsel %vm555_vm1, %v706_v39, %v705_v21  ;;  %v710_v48 = vrot.slane %v2050_v18, 4 }
 0x131   : > { %v675_v38 = vsel %vm561_vm3, %v674_v29, %v673_v32  ;;  %v739_v49 = vrot.slane %v1999_v30, 2  ;;  %v693_v50 = vrot.slane %v1999_v30, 6  ;;  %v626_v51 = vpack.c.b16 %v625_v41, %v625_v41 }
 0x132   : > { %615 = vrot.lane.b32.xlu2 %v614_v25, %s1888_s24  ;;  %v676_v45 = vpack.c.b16 %v675_v38, %v675_v38  ;;  %v655_v52 = vpack.c.b16 %v654_v42, %v654_v42  ;;  %v709_v23 = vsel %vm558_vm2, %v708_v40, %v707_v47  ;;  %v743_v54 = vrot.slane %v2050_v18, 7 }
 0x133   : > { %v741_v53 = vsel %vm555_vm1, %v740_v43, %v739_v49  ;;  %v695_v55 = vsel %vm555_vm1, %v694_v44, %v693_v50  ;;  %v698_v56 = vrot.slane %v2050_v18, 3  ;;  %v711_v59 = vsel %vm561_vm3, %v710_v48, %v709_v23 }
 0x134   : > { %577 = vrot.lane.b32.xlu0 %v576_v20, %s1889_s25  ;;  %603 = vrot.lane.b32.xlu1 %v602_v31, %s1890_s26  ;;  %v742_v57 = vsel %vm558_vm2, %v2038_v9, %v741_v53  ;;  %v697_v58 = vsel %vm558_vm2, %v696_v46, %v695_v55  ;;  %v717_v61 = vrot.slane %v2027_v60, 7  ;;  %v719_v62 = vrot.slane %v2038_v9, 6 }
 0x135   : > { %v744_v63 = vsel %vm561_vm3, %v743_v54, %v742_v57  ;;  %v699_v0 = vsel %vm561_vm3, %v698_v56, %v697_v58  ;;  %v682_v1 = vrot.slane %v2027_v60, 4  ;;  %v753_v2 = vrot.slane %v2027_v60, 2 }
 0x136   : > { %v712_v3 = vpack.c.b16 %v711_v59, %v711_v59  ;;  %v684_v4 = vrot.slane %v2038_v9, 3  ;;  %v755_v5 = vrot.slane %v2038_v9, 1  ;;  %v718_v6 = vsel %vm555_vm1, %v717_v61, %v1999_v30 }
 0x137   : > { %v721_v7 = vrot.slane %v2050_v18, 5  ;;  %v681_v8 = vrot.slane %v1999_v30, 5  ;;  %v752_v10 = vrot.slane %v1999_v30, 3  ;;  %v745_v11 = vpack.c.b16 %v744_v63, %v744_v63 }
 0x138   : > { %v700_v12 = vpack.c.b16 %v699_v0, %v699_v0  ;;  %v720_v13 = vsel %vm558_vm2, %v719_v62, %v718_v6  ;;  %v686_v15 = vrot.slane %v2050_v18, 2  ;;  %v730_v27 = vrot.slane %v2038_v9, 7 }
 0x139   : > { %v683_v14 = vsel %vm555_vm1, %v682_v1, %v681_v8  ;;  %v754_v16 = vsel %vm555_vm1, %v753_v2, %v752_v10  ;;  %v722_v22 = vsel %vm561_vm3, %v721_v7, %v720_v13  ;;  %v728_v28 = vrot.slane %v1999_v30, 1  ;;  %v763_v2 = vld [vmem:[%s2418_s4] sm:$0xf] }
 0x13a   : > { %677 = vrot.lane.b32.xlu2 %v676_v45, %s1885_s21  ;;  %v685_v17 = vsel %vm558_vm2, %v684_v4, %v683_v14  ;;  %v756_v19 = vsel %vm558_vm2, %v755_v5, %v754_v16  ;;  %v723_v26 = vpack.c.b16 %v722_v22, %v722_v22  ;;  %v732_v32 = vrot.slane %v2050_v18, 6  ;;  %v1791_v22 = vld [vmem:[%s2418_s4 + $0x4] sm:$0xf] }
 0x13b   : > { %v687_v24 = vsel %vm561_vm3, %v686_v15, %v685_v17  ;;  %v757_v25 = vsel %vm561_vm3, %v2050_v18, %v756_v19  ;;  %v729_v31 = vsel %vm555_vm1, %v2027_v60, %v728_v28  ;;  %v1893_v30 = vmov 0   ;;  %v533_v60 = vpop.permute.xlu1 %532 }
 0x13c   : > { %627 = vrot.lane.b32.xlu0 %v626_v51, %s1891_s29  ;;  %656 = vrot.lane.b32.xlu1 %v655_v52, %s1892_s30  ;;  %v688_v29 = vpack.c.b16 %v687_v24, %v687_v24  ;;  %v758_v20 = vpack.c.b16 %v757_v25, %v757_v25  ;;  %v731_v33 = vsel %vm558_vm2, %v730_v27, %v729_v31  ;;  %v534_v18 = vrot.slane %v533_v60, 4  ;;  %v1800_v31 = vld [vmem:[%s2418_s4 + $0x10] sm:$0xf] }
 0x13d   : > { %v733_v34 = vsel %vm561_vm3, %v732_v32, %v731_v33  ;;  %367 = vst.msk [vmem:[#allocation2] sm:$0xf] %vm366_vm4, %v1893_v30  ;;  %1874 = vset.pattern.permute.xlu2 %v1893_v30  ;;  %1875 = vset.pattern.permute.xlu1 %v1893_v30  ;;  %vm645_vm1 = vcmask 1044362   ;;  %vm646_vm2 = vcmask 7174   ;;  %vm642_vm3 = vcmask 924672  }
 0x13e   : > { %v734_v9 = vpack.c.b16 %v733_v34, %v733_v34  ;;  %369 = vst.msk [vmem:[#allocation2 + $0x8] sm:$0xf] %vm368_vm5, %v1893_v30  ;;  %1876 = vset.pattern.permute.xlu0 %v1893_v30  ;;  %v536_v35 = vsel %vm535_vm8, %v534_v18, %v533_v60  ;;  %vm2140_vm6 = vmor %vm646_vm2, %vm645_vm1  ;;  %vm1172_vm1 = vcmask 769024   ;;  %vm1124_vm2 = vcmask 777216  }
 0x13f   : > { %370 = vst.msk [vmem:[#allocation3] sm:$0xf] %vm366_vm4, %v1893_v30 }
 0x140   : > { %371 = vst.msk [vmem:[#allocation3 + $0x8] sm:$0xf] %vm368_vm5, %v1893_v30  ;;  %vm630_vm5 = vcmask 921354  }
 0x141   : > { %544 = vst.msk [vmem:[#allocation2 + $0x8] sm:$0x3] %vm543_vm9, %v534_v18  ;;  %vm773_vm9 = vcmask 1043456  }
 0x142   : > { %713 = vrot.lane.b32.xlu2 %v712_v3, %s1890_s26  ;;  %542 = vst.msk [vmem:[#allocation2] sm:$0x33] %vm541_vm10, %v536_v35  ;;  %vm876_vm10 = vcmask 1031168   ;;  %v1797_v35 = vld [vmem:[%s2418_s4 + $0xc] sm:$0xf] }
 0x144   : > { %746 = vrot.lane.b32.xlu0 %v745_v11, %s1886_s22  ;;  %701 = vrot.lane.b32.xlu1 %v700_v12, %s1887_s23  ;;  %v1794_v11 = vld [vmem:[%s2418_s4 + $0x8] sm:$0xf] }
 0x14a   : > { %724 = vrot.lane.b32.xlu2 %v723_v26, %s1888_s24 }
 0x14c   : > { %689 = vrot.lane.b32.xlu0 %v688_v29, %s1889_s25  ;;  %759 = vrot.lane.b32.xlu1 %v758_v20, %s1892_s30 }
 0x154   : > { %735 = vrot.lane.b32.xlu0 %v734_v9, %s1891_s29 }
 0x184   : > { %v640_v36 = vpop.permute.xlu2 %639 }
 0x185   : > { %v641_v41 = vrot.slane %v640_v36, 4 }
 0x187   : > { %v643_v45 = vsel %vm642_vm3, %v641_v41, %v640_v36 }
 0x18c   : > { %v616_v39 = vpop.permute.xlu2 %615 }
 0x194   : > { %v678_v42 = vpop.permute.xlu2 %677 }
 0x19c   : > { %v714_v48 = vpop.permute.xlu2 %713 }
 0x19e   : > { %v565_v37 = vpop.permute.xlu0 %564  ;;  %v591_v38 = vpop.permute.xlu1 %590 }
 0x19f   : > { %568 = vst.msk [vmem:[#allocation2] sm:$0xc] %vm567_vm11, %v565_v37 }
 0x1a4   : > { %v725_v51 = vpop.permute.xlu2 %724 }
 0x1a6   : > { %v578_v21 = vpop.permute.xlu0 %577  ;;  %v604_v40 = vpop.permute.xlu1 %603 }
 0x1a7   : > { %581 = vst.msk [vmem:[#allocation2] sm:$0xc] %vm580_vm12, %v578_v21 }
 0x1a8   : > { %594 = vst.msk [vmem:[#allocation2] sm:$0xc] %vm593_vm13, %v591_v38  ;;  %v1214_v38 = vld [vmem:[%s2419_s5] sm:$0xff] }
 0x1a9   : > { %607 = vst.msk [vmem:[#allocation2] sm:$0xc] %vm606_vm14, %v604_v40 }
 0x1aa   : > { %619 = vst.msk [vmem:[#allocation2] sm:$0xc] %vm618_vm15, %v616_v39 }
 0x1ae   : > { %v628_v44 = vpop.permute.xlu0 %627  ;;  %v657_v46 = vpop.permute.xlu1 %656 }
 0x1af   : > { %631 = vst.msk [vmem:[#allocation2] sm:$0xc] %vm630_vm5, %v628_v44 }
 0x1b0   : > { %648 = vst.msk [vmem:[#allocation2] sm:$0xcc] %vm2140_vm6, %v643_v45 }
 0x1b1   : > { %660 = vst.msk [vmem:[#allocation2 + $0x4] sm:$0xc] %vm659_vm7, %v657_v46 }
 0x1b2   : > { %680 = vst.msk [vmem:[#allocation2 + $0x4] sm:$0xc] %vm567_vm11, %v678_v42  ;;  %vm828_vm11 = vcmask 1039360   ;;  %v1806_v42 = vld [vmem:[%s2418_s4 + $0x18] sm:$0xf] }
 0x1b6   : > { %v747_v47 = vpop.permute.xlu0 %746  ;;  %v702_v49 = vpop.permute.xlu1 %701 }
 0x1b7   : > { %v748_v52 = vrot.slane %v747_v47, 4 }
 0x1b9   : > { %v749_v53 = vsel %vm642_vm3, %v748_v52, %v747_v47 }
 0x1be   : > { %v690_v50 = vpop.permute.xlu0 %689  ;;  %v760_v54 = vpop.permute.xlu1 %759 }
 0x1bf   : > { %692 = vst.msk [vmem:[#allocation2 + $0x4] sm:$0xc] %vm580_vm12, %v690_v50  ;;  %vm976_vm12 = vcmask 908288   ;;  %v1803_v50 = vld [vmem:[%s2418_s4 + $0x14] sm:$0xf] }
 0x1c0   : > { %704 = vst.msk [vmem:[#allocation2 + $0x4] sm:$0xc] %vm593_vm13, %v702_v49  ;;  %vm926_vm13 = vcmask 916480  }
 0x1c1   : > { %716 = vst.msk [vmem:[#allocation2 + $0x4] sm:$0xc] %vm606_vm14, %v714_v48  ;;  %vm1074_vm14 = vcmask 785408  }
 0x1c2   : > { %727 = vst.msk [vmem:[#allocation2 + $0x4] sm:$0xc] %vm618_vm15, %v725_v51  ;;  %vm1024_vm15 = vcmask 900096  }
 0x1c6   : > { %v736_v23 = vpop.permute.xlu0 %735 }
 0x1c7   : > { %738 = vst.msk [vmem:[#allocation2 + $0x4] sm:$0xc] %vm630_vm5, %v736_v23 }
 0x1c8   : > { %751 = vst.msk [vmem:[#allocation2 + $0x4] sm:$0xcc] %vm2140_vm6, %v749_v53 }
 0x1c9   : > { %762 = vst.msk [vmem:[#allocation2 + $0x8] sm:$0xc] %vm659_vm7, %v760_v54 }
 0x1cf   : > { %v812_v55 = vld [vmem:[#allocation2] sm:$0xff] }
 0x1d0   : > { %v817_v56 = vunpack.c.h.b16 %v812_v55  ;;  %v816_v57 = vunpack.c.l.b16 %v812_v55  ;;  %v813_v58 = vld [vmem:[#allocation2 + $0x8] sm:$0xf] }
 0x1d1   : > { %v818_v59 = vunpack.c.l.b16 %v813_v58 }
 0x1d2   : > { %v820_v61 = vpack.c.b16 %v817_v56, %v817_v56  ;;  %v819_v62 = vpack.c.b16 %v816_v57, %v816_v57  ;;  %v1812_v57 = vld [vmem:[%s2418_s4 + $0x20] sm:$0xf] }
 0x1d3   : > { %v821_v63 = vpack.c.b16 %v818_v59, %v818_v59 }
 0x1d4   : > { %872 = vrot.lane.b32.xlu0 %v820_v61, %s1894_s9  ;;  %870 = vrot.lane.b32.xlu2 %v819_v62, %s1894_s9  ;;  %v775_v0 = vsel %vm773_vm9, %v819_v62, 0  ;;  %v778_v1 = vsel %vm773_vm9, %v820_v61, 0 }
 0x1d5   : > { %787 = vmatpush.bf16.msra.mxu2 %v775_v0  ;;  %800 = vmatpush.bf16.msra.mxu3 %v778_v1 }
 0x1d6   : > { %874 = vrot.lane.b32.xlu1 %v821_v63, %s1894_s9 }
 0x1d8   : > { %1789 = vmatmul.msk.bf16.vlgmr.msra.gmra.mxu2 %vm377_vm0, %v763_v2  ;;  %1790 = vmatmul.msk.bf16.vlgmr.msra.gmra.mxu3 %vm377_vm0, %v763_v2  ;;  %v1809_v2 = vld [vmem:[%s2418_s4 + $0x1c] sm:$0xf] }
 0x1dc   : > { %824 = vrot.lane.b32.xlu0 %v820_v61, %s1895_s10  ;;  %822 = vrot.lane.b32.xlu2 %v819_v62, %s1895_s10 }
 0x1de   : > { %826 = vrot.lane.b32.xlu1 %v821_v63, %s1895_s10 }
 0x1e4   : > { %972 = vrot.lane.b32.xlu0 %v820_v61, %s1896_s11  ;;  %970 = vrot.lane.b32.xlu2 %v819_v62, %s1896_s11 }
 0x1e6   : > { %974 = vrot.lane.b32.xlu1 %v821_v63, %s1896_s11 }
 0x1ec   : > { %922 = vrot.lane.b32.xlu0 %v820_v61, %s1897_s12  ;;  %920 = vrot.lane.b32.xlu2 %v819_v62, %s1897_s12 }
 0x1ee   : > { %924 = vrot.lane.b32.xlu1 %v821_v63, %s1897_s12 }
 0x1f4   : > { %1070 = vrot.lane.b32.xlu0 %v820_v61, %s1898_s13  ;;  %1068 = vrot.lane.b32.xlu2 %v819_v62, %s1898_s13 }
 0x1f6   : > { %1072 = vrot.lane.b32.xlu1 %v821_v63, %s1898_s13 }
 0x1fc   : > { %1020 = vrot.lane.b32.xlu0 %v820_v61, %s1899_s14  ;;  %1018 = vrot.lane.b32.xlu2 %v819_v62, %s1899_s14 }
 0x1fe   : > { %1022 = vrot.lane.b32.xlu1 %v821_v63, %s1899_s14 }
 0x204   : > { %1168 = vrot.lane.b32.xlu0 %v820_v61, %s1900_s15  ;;  %1166 = vrot.lane.b32.xlu2 %v819_v62, %s1900_s15 }
 0x206   : > { %1170 = vrot.lane.b32.xlu1 %v821_v63, %s1900_s15 }
 0x20c   : > { %1120 = vrot.lane.b32.xlu0 %v820_v61, %s1901_s16  ;;  %1118 = vrot.lane.b32.xlu2 %v819_v62, %s1901_s16 }
 0x20e   : > { %1122 = vrot.lane.b32.xlu1 %v821_v63, %s1901_s16 }
 0x214   : > { %1217 = vperm.xlu2 %1874, %v1214_v38  }
 0x22e   : > { %v871_v3 = vpop.permute.xlu2 %870 }
 0x236   : > { %v823_v4 = vpop.permute.xlu2 %822 }
 0x23e   : > { %v971_v13 = vpop.permute.xlu2 %970 }
 0x246   : > { %v873_v5 = vpop.permute.xlu0 %872  ;;  %v921_v25 = vpop.permute.xlu2 %920 }
 0x247   : > { %v877_v6 = vsel %vm876_vm10, %v871_v3, %v873_v5 }
 0x248   : > { %v883_v7 = vsel %vm773_vm9, %v877_v6, 0  ;;  %v875_v8 = vpop.permute.xlu1 %874 }
 0x249   : > { %v878_v10 = vsel %vm876_vm10, %v873_v5, %v875_v8  ;;  %895 = vmatpush.bf16.msrb.mxu2 %v883_v7 }
 0x24a   : > { %v886_v12 = vsel %vm773_vm9, %v878_v10, 0 }
 0x24b   : > { %908 = vmatpush.bf16.msrb.mxu3 %v886_v12 }
 0x24c   : > { %1795 = vmatmul.msk.bf16.vlgmr.msrb.gmra.mxu2 %vm377_vm0, %v1794_v11 }
 0x24e   : > { %v825_v14 = vpop.permute.xlu0 %824  ;;  %1796 = vmatmul.msk.bf16.vlgmr.msrb.gmra.mxu3 %vm377_vm0, %v1794_v11  ;;  %v1069_v9 = vpop.permute.xlu2 %1068 }
 0x24f   : > { %v829_v15 = vsel %vm828_vm11, %v823_v4, %v825_v14 }
 0x250   : > { %v827_v16 = vpop.permute.xlu1 %826  ;;  %v835_v17 = vsel %vm773_vm9, %v829_v15, 0 }
 0x251   : > { %v830_v19 = vsel %vm828_vm11, %v825_v14, %v827_v16  ;;  %847 = vmatpush.bf16.msrb.mxu0 %v835_v17  ;;  %v327_v16 = vlaneseq }
 0x252   : > { %v838_v24 = vsel %vm773_vm9, %v830_v19, 0 }
 0x253   : > { %860 = vmatpush.bf16.msra.mxu1 %v838_v24  ;;  %v328_v19 = vand.u32 127, %v327_v16 }
 0x254   : > { %1792 = vmatmul.msk.bf16.vlgmr.msrb.gmra.mxu0 %vm377_vm0, %v1791_v22 }
 0x256   : > { %1793 = vmatmul.msk.bf16.vlgmr.msra.gmra.mxu1 %vm377_vm0, %v1791_v22  ;;  %v973_v26 = vpop.permute.xlu0 %972  ;;  %v1019_v43 = vpop.permute.xlu2 %1018 }
 0x257   : > { %v977_v27 = vsel %vm976_vm12, %v971_v13, %v973_v26 }
 0x258   : > { %v983_v28 = vsel %vm773_vm9, %v977_v27, 0  ;;  %v975_v29 = vpop.permute.xlu1 %974 }
 0x259   : > { %v978_v20 = vsel %vm976_vm12, %v973_v26, %v975_v29  ;;  %995 = vmatpush.bf16.msra.mxu2 %v983_v28  ;;  %v329_v26 = vadd.s32 128, %v328_v19  ;;  %v334_v28 = vand.u32 15, %v328_v19 }
 0x25a   : > { %v986_v32 = vsel %vm773_vm9, %v978_v20, 0 }
 0x25b   : > { %1008 = vmatpush.bf16.msra.mxu3 %v986_v32  ;;  %v789_v4 = vpop.f32.mrf.mxu2  ;;  %v802_v5 = vpop.f32.mrf.mxu3  ;;  %v341_v29 = vand.u32 15, %v329_v26  ;;  %vm354_vm3 = vcmp.ne.s32.totalorder %v334_v28, 0  ;;  %vm360_vm6 = vcmp.ne.s32.totalorder %v334_v28, 15 }
 0x25c   : > { %1801 = vmatmul.msk.bf16.vlgmr.msra.gmra.mxu2 %vm377_vm0, %v1800_v31 }
 0x25d   : > { %vm355_vm5 = vcmp.ne.s32.totalorder %v341_v29, 0  ;;  %vm361_vm7 = vcmp.ne.s32.totalorder %v341_v29, 15 }
 0x25e   : > { %v923_v33 = vpop.permute.xlu0 %922  ;;  %1802 = vmatmul.msk.bf16.vlgmr.msra.gmra.mxu3 %vm377_vm0, %v1800_v31  ;;  %v1167_v52 = vpop.permute.xlu2 %1166 }
 0x25f   : > { %v927_v34 = vsel %vm926_vm13, %v921_v25, %v923_v33 }
 0x260   : > { %v933_v30 = vsel %vm773_vm9, %v927_v34, 0  ;;  %v925_v60 = vpop.permute.xlu1 %924 }
 0x261   : > { %v928_v18 = vsel %vm926_vm13, %v923_v33, %v925_v60  ;;  %945 = vmatpush.bf16.msra.mxu0 %v933_v30  ;;  %v1902_v33 = vmov 0.0  }
 0x262   : > { %v936_v36 = vsel %vm773_vm9, %v928_v18, 0  ;;  %v2265_v34 = vsel %vm354_vm3, 1.0, %v1902_v33  ;;  %v2267_v30 = vsel %vm355_vm5, 1.0, %v1902_v33  ;;  %v2269_v60 = vsel %vm360_vm6, 1.0, %v1902_v33 }
 0x263   : > { %958 = vmatpush.bf16.msrb.mxu1 %v936_v36  ;;  %v791_v6 = vpop.f32.mrf.mxu2  ;;  %v804_v7 = vpop.f32.mrf.mxu3  ;;  %v806_v18 = vmul.f32 %v2265_v34, %v789_v4  ;;  %vm1232_vm3 = vcmask 1043592   ;;  %vm1233_vm5 = vcmask 1047556  }
 0x264   : > { %1798 = vmatmul.msk.bf16.vlgmr.msra.gmra.mxu0 %vm377_vm0, %v1797_v35  ;;  %vm1234_vm6 = vmor %vm1233_vm5, %vm1232_vm3 }
 0x266   : > { %1799 = vmatmul.msk.bf16.vlgmr.msrb.gmra.mxu1 %vm377_vm0, %v1797_v35  ;;  %v1071_v37 = vpop.permute.xlu0 %1070  ;;  %v1119_v59 = vpop.permute.xlu2 %1118  ;;  %v2272_v35 = vsel %vm361_vm7, 1.0, %v1902_v33 }
 0x267   : > { %v1075_v39 = vsel %vm1074_vm14, %v1069_v9, %v1071_v37 }
 0x268   : > { %v1081_v21 = vsel %vm773_vm9, %v1075_v39, 0  ;;  %v1073_v40 = vpop.permute.xlu1 %1072 }
 0x269   : > { %v1076_v41 = vsel %vm1074_vm14, %v1071_v37, %v1073_v40  ;;  %1093 = vmatpush.bf16.msrb.mxu2 %v1081_v21  ;;  %v807_v37 = vmul.f32 %v2267_v30, %v802_v5 }
 0x26a   : > { %v1084_v44 = vsel %vm773_vm9, %v1076_v41, 0 }
 0x26b   : > { %1106 = vmatpush.bf16.msrb.mxu3 %v1084_v44 }
 0x26c   : > { %1807 = vmatmul.msk.bf16.vlgmr.msrb.gmra.mxu2 %vm377_vm0, %v1806_v42 }
 0x26e   : > { %v1021_v45 = vpop.permute.xlu0 %1020  ;;  %1808 = vmatmul.msk.bf16.vlgmr.msrb.gmra.mxu3 %vm377_vm0, %v1806_v42  ;;  %v1218_v7 = vpop.permute.xlu2 %1217 }
 0x26f   : > { %v1025_v46 = vsel %vm1024_vm15, %v1019_v43, %v1021_v45 }
 0x270   : > { %v1031_v47 = vsel %vm773_vm9, %v1025_v46, 0  ;;  %v1023_v48 = vpop.permute.xlu1 %1022 }
 0x271   : > { %v1026_v49 = vsel %vm1024_vm15, %v1021_v45, %v1023_v48  ;;  %1043 = vmatpush.bf16.msrb.mxu0 %v1031_v47 }
 0x272   : > { %v1034_v51 = vsel %vm773_vm9, %v1026_v49, 0 }
 0x273   : > { %1056 = vmatpush.bf16.msra.mxu1 %v1034_v51 }
 0x274   : > { %1804 = vmatmul.msk.bf16.vlgmr.msrb.gmra.mxu0 %vm377_vm0, %v1803_v50 }
 0x276   : > { %1805 = vmatmul.msk.bf16.vlgmr.msra.gmra.mxu1 %vm377_vm0, %v1803_v50  ;;  %v1169_v23 = vpop.permute.xlu0 %1168 }
 0x277   : > { %v1173_v53 = vsel %vm1172_vm1, %v1167_v52, %v1169_v23 }
 0x278   : > { %v1179_v54 = vsel %vm773_vm9, %v1173_v53, 0  ;;  %v1171_v55 = vpop.permute.xlu1 %1170 }
 0x279   : > { %v1174_v56 = vsel %vm1172_vm1, %v1169_v23, %v1171_v55  ;;  %1191 = vmatpush.bf16.msra.mxu2 %v1179_v54 }
 0x27a   : > { %v1182_v58 = vsel %vm773_vm9, %v1174_v56, 0 }
 0x27b   : > { %1204 = vmatpush.bf16.msra.mxu3 %v1182_v58 }
 0x27c   : > { %1813 = vmatmul.msk.bf16.vlgmr.msra.gmra.mxu2 %vm377_vm0, %v1812_v57 }
 0x27e   : > { %v1121_v61 = vpop.permute.xlu0 %1120  ;;  %1814 = vmatmul.msk.bf16.vlgmr.msra.gmra.mxu3 %vm377_vm0, %v1812_v57 }
 0x27f   : > { %v1125_v62 = vsel %vm1124_vm2, %v1119_v59, %v1121_v61 }
 0x280   : > { %v1131_v63 = vsel %vm773_vm9, %v1125_v62, 0  ;;  %v1123_v0 = vpop.permute.xlu1 %1122 }
 0x281   : > { %v1126_v1 = vsel %vm1124_vm2, %v1121_v61, %v1123_v0  ;;  %1143 = vmatpush.bf16.msra.mxu0 %v1131_v63 }
 0x282   : > { %v1134_v3 = vsel %vm773_vm9, %v1126_v1, 0 }
 0x283   : > { %1156 = vmatpush.bf16.msrb.mxu1 %v1134_v3 }
 0x284   : > { %1810 = vmatmul.msk.bf16.vlgmr.msra.gmra.mxu0 %vm377_vm0, %v1809_v2 }
 0x286   : > { %1811 = vmatmul.msk.bf16.vlgmr.msrb.gmra.mxu1 %vm377_vm0, %v1809_v2 }
 0x2cf   : > { %v897_v8 = vpop.f32.mrf.mxu2 }
 0x2d0   : > { %v914_v39 = vmul.f32 %v2269_v60, %v897_v8 }
 0x2d1   : > { %v849_v10 = vpop.f32.mrf.mxu0  ;;  %v910_v11 = vpop.f32.mrf.mxu3 }
 0x2d2   : > { %v866_v38 = vadd.f32 %v849_v10, %v806_v18  ;;  %v915_v41 = vmul.f32 %v2272_v35, %v910_v11 }
 0x2d3   : > { %v862_v12 = vpop.f32.mrf.mxu1 }
 0x2d4   : > { %v867_v42 = vadd.f32 %v862_v12, %v807_v37  ;;  %v916_v45 = vadd.f32 %v914_v39, %v866_v38  ;;  %v1237_v38 = vld [vmem:[%s2420_s6] sm:$0x3] }
 0x2d6   : > { %v917_v47 = vadd.f32 %v915_v41, %v867_v42 }
 0x2d7   : > { %v899_v13 = vpop.f32.mrf.mxu2 }
 0x2d9   : > { %v851_v14 = vpop.f32.mrf.mxu0  ;;  %v912_v15 = vpop.f32.mrf.mxu3 }
 0x2db   : > { %v864_v17 = vpop.f32.mrf.mxu1 }
 0x2df   : > { %v997_v22 = vpop.f32.mrf.mxu2 }
 0x2e1   : > { %v947_v24 = vpop.f32.mrf.mxu0  ;;  %v1010_v25 = vpop.f32.mrf.mxu3 }
 0x2e2   : > { %v964_v43 = vmul.f32 %v2265_v34, %v947_v24 }
 0x2e3   : > { %v960_v27 = vpop.f32.mrf.mxu1 }
 0x2e4   : > { %v965_v46 = vmul.f32 %v2267_v30, %v960_v27  ;;  %v966_v48 = vadd.f32 %v964_v43, %v916_v45 }
 0x2e6   : > { %v967_v50 = vadd.f32 %v965_v46, %v917_v47  ;;  %v1014_v53 = vadd.f32 %v997_v22, %v966_v48  ;;  %v1817_v46 = vld [vmem:[%s2420_s6 + $0x2] sm:$0x3] }
 0x2e7   : > { %v999_v20 = vpop.f32.mrf.mxu2 }
 0x2e8   : > { %v1015_v58 = vadd.f32 %v1010_v25, %v967_v50 }
 0x2e9   : > { %v949_v31 = vpop.f32.mrf.mxu0  ;;  %v1012_v32 = vpop.f32.mrf.mxu3 }
 0x2eb   : > { %v962_v9 = vpop.f32.mrf.mxu1 }
 0x2ef   : > { %v1095_v36 = vpop.f32.mrf.mxu2 }
 0x2f0   : > { %v1112_v57 = vmul.f32 %v2265_v34, %v1095_v36 }
 0x2f1   : > { %v1045_v21 = vpop.f32.mrf.mxu0  ;;  %v1108_v40 = vpop.f32.mrf.mxu3 }
 0x2f2   : > { %v1062_v51 = vmul.f32 %v2269_v60, %v1045_v21  ;;  %v1113_v62 = vmul.f32 %v2267_v30, %v1108_v40 }
 0x2f3   : > { %v1058_v44 = vpop.f32.mrf.mxu1 }
 0x2f4   : > { %v1063_v54 = vmul.f32 %v2272_v35, %v1058_v44  ;;  %v1064_v56 = vadd.f32 %v1062_v51, %v1014_v53  ;;  %v1820_v53 = vld [vmem:[%s2420_s6 + $0x4] sm:$0x3] }
 0x2f6   : > { %v1065_v59 = vadd.f32 %v1063_v54, %v1015_v58  ;;  %v1114_v63 = vadd.f32 %v1112_v57, %v1064_v56 }
 0x2f7   : > { %v1097_v49 = vpop.f32.mrf.mxu2 }
 0x2f8   : > { %v1115_v5 = vadd.f32 %v1113_v62, %v1065_v59  ;;  %v1823_v62 = vld [vmem:[%s2420_s6 + $0x6] sm:$0x3] }
 0x2f9   : > { %v1047_v52 = vpop.f32.mrf.mxu0  ;;  %v1110_v23 = vpop.f32.mrf.mxu3 }
 0x2fb   : > { %v1060_v55 = vpop.f32.mrf.mxu1 }
 0x2ff   : > { %v1193_v61 = vpop.f32.mrf.mxu2 }
 0x300   : > { %v1210_v0 = vmul.f32 %v2269_v60, %v1193_v61 }
 0x301   : > { %v1145_v1 = vpop.f32.mrf.mxu0  ;;  %v1206_v2 = vpop.f32.mrf.mxu3 }
 0x302   : > { %v1162_v3 = vadd.f32 %v1145_v1, %v1114_v63  ;;  %v1211_v4 = vmul.f32 %v2272_v35, %v1206_v2 }
 0x303   : > { %v1158_v6 = vpop.f32.mrf.mxu1 }
 0x304   : > { %v1212_v8 = vadd.f32 %v1210_v0, %v1162_v3  ;;  %v1163_v10 = vadd.f32 %v1158_v6, %v1115_v5  ;;  %v1826_v6 = vld [vmem:[%s2420_s6 + $0x8] sm:$0x3] }
 0x306   : > { %v1213_v11 = vadd.f32 %v1211_v4, %v1163_v10  ;;  %v1220_v12 = vadd.f32 %v1218_v7, %v1212_v8 }
 0x307   : > { %v1195_v13 = vpop.f32.mrf.mxu2 }
 0x308   : > { %v1221_v14 = vadd.f32 %v1218_v7, %v1213_v11  ;;  %v1222_v15 = vmax.f32 %v1220_v12, 0.0  ;;  %v1679_v7 = vld [vmem:[%s2421_s7] sm:$0xf] }
 0x309   : > { %v1147_v16 = vpop.f32.mrf.mxu0  ;;  %v1208_v17 = vpop.f32.mrf.mxu3 }
 0x30a   : > { %v1223_v19 = vmax.f32 %v1221_v14, 0.0  ;;  %v1829_v16 = vld [vmem:[%s2420_s6 + $0xa] sm:$0x3] }
 0x30b   : > { %v1160_v22 = vpop.f32.mrf.mxu1 }
 0x30c   : > { %v1224_v24 = vpack.c.bf16 %v1223_v19, %v1222_v15 }
 0x30e   : > { %1226 = vrot.lane.b32.xlu0 %v1224_v24, %s1885_s21  ;;  %s1845_s21 = sshll.u32 %s2426_s28, 3 }
 0x380   : > { %v1227_v25 = vpop.permute.xlu0 %1226 }
 0x381   : > { %v1228_v26 = vrot.slane %v1227_v25, 4 }
 0x383   : > { %v1229_v27 = vsel %vm535_vm8, %v1228_v26, %v1227_v25  ;;  %1236 = vst.msk [vmem:[#allocation3 + $0x8] sm:$0xf] %vm366_vm4, %v1228_v26 }
 0x384   : > { %1235 = vst.msk [vmem:[#allocation3] sm:$0xff] %vm1234_vm6, %v1229_v27  ;;  %v1832_v27 = vld [vmem:[%s2420_s6 + $0xc] sm:$0x3] }
 0x38a   : > { %v1286_v28 = vld [vmem:[#allocation3 + $0x8] sm:$0xf] }
 0x38b   : > { %v1291_v29 = vunpack.c.l.b16 %v1286_v28  ;;  %v1285_v20 = vld [vmem:[#allocation3] sm:$0xff] }
 0x38c   : > { %v1290_v31 = vunpack.c.h.b16 %v1285_v20  ;;  %v1289_v32 = vunpack.c.l.b16 %v1285_v20 }
 0x38d   : > { %v1294_v33 = vpack.c.b16 %v1291_v29, %v1291_v29 }
 0x38e   : > { %v1293_v9 = vpack.c.b16 %v1290_v31, %v1290_v31  ;;  %v1292_v18 = vpack.c.b16 %v1289_v32, %v1289_v32 }
 0x38f   : > { %1299 = vrot.lane.b32.xlu2 %v1294_v33, %s1895_s10 }
 0x390   : > { %1297 = vrot.lane.b32.xlu1 %v1293_v9, %s1895_s10  ;;  %1295 = vrot.lane.b32.xlu0 %v1292_v18, %s1895_s10  ;;  %v1248_v36 = vsel %vm773_vm9, %v1292_v18, 0  ;;  %v1251_v37 = vsel %vm773_vm9, %v1293_v9, 0 }
 0x391   : > { %1260 = vmatpush.bf16.msrb.mxu0 %v1248_v36  ;;  %1273 = vmatpush.bf16.msra.mxu1 %v1251_v37 }
 0x394   : > { %1815 = vmatmul.msk.bf16.vlgmr.msrb.gmra.mxu0 %vm377_vm0, %v1237_v38  ;;  %1816 = vmatmul.msk.bf16.vlgmr.msra.gmra.mxu1 %vm377_vm0, %v1237_v38 }
 0x397   : > { %1346 = vrot.lane.b32.xlu2 %v1294_v33, %s1894_s9 }
 0x398   : > { %1344 = vrot.lane.b32.xlu1 %v1293_v9, %s1894_s9  ;;  %1342 = vrot.lane.b32.xlu0 %v1292_v18, %s1894_s9 }
 0x39f   : > { %1395 = vrot.lane.b32.xlu2 %v1294_v33, %s1897_s12 }
 0x3a0   : > { %1393 = vrot.lane.b32.xlu1 %v1293_v9, %s1897_s12  ;;  %1391 = vrot.lane.b32.xlu0 %v1292_v18, %s1897_s12 }
 0x3a7   : > { %1444 = vrot.lane.b32.xlu2 %v1294_v33, %s1896_s11 }
 0x3a8   : > { %1442 = vrot.lane.b32.xlu1 %v1293_v9, %s1896_s11  ;;  %1440 = vrot.lane.b32.xlu0 %v1292_v18, %s1896_s11  ;;  %s325_s11 = scalar_lea.vmem %s2422_s8, %s1845_s21 }
 0x3af   : > { %1491 = vrot.lane.b32.xlu2 %v1294_v33, %s1899_s14 }
 0x3b0   : > { %1489 = vrot.lane.b32.xlu1 %v1293_v9, %s1899_s14  ;;  %1487 = vrot.lane.b32.xlu0 %v1292_v18, %s1899_s14 }
 0x3b7   : > { %1540 = vrot.lane.b32.xlu2 %v1294_v33, %s1898_s13 }
 0x3b8   : > { %1538 = vrot.lane.b32.xlu1 %v1293_v9, %s1898_s13  ;;  %1536 = vrot.lane.b32.xlu0 %v1292_v18, %s1898_s13 }
 0x3bf   : > { %1589 = vrot.lane.b32.xlu2 %v1294_v33, %s1901_s16 }
 0x3c0   : > { %1587 = vrot.lane.b32.xlu1 %v1293_v9, %s1901_s16  ;;  %1585 = vrot.lane.b32.xlu0 %v1292_v18, %s1901_s16 }
 0x3c7   : > { %1636 = vrot.lane.b32.xlu2 %v1294_v33, %s1900_s15 }
 0x3c8   : > { %1634 = vrot.lane.b32.xlu1 %v1293_v9, %s1900_s15  ;;  %1632 = vrot.lane.b32.xlu0 %v1292_v18, %s1900_s15  ;;  %v1835_v18 = vld [vmem:[%s2420_s6 + $0xe] sm:$0x3] }
 0x3d0   : > { %1682 = vperm.xlu1 %1875, %v1679_v7  }
 0x3e9   : > { %v1300_v39 = vpop.permute.xlu2 %1299 }
 0x3f1   : > { %v1347_v21 = vpop.permute.xlu2 %1346 }
 0x3f9   : > { %v1396_v47 = vpop.permute.xlu2 %1395 }
 0x401   : > { %v1445_v54 = vpop.permute.xlu2 %1444 }
 0x402   : > { %v1298_v40 = vpop.permute.xlu1 %1297  ;;  %v1296_v41 = vpop.permute.xlu0 %1295 }
 0x403   : > { %v1302_v42 = vsel %vm828_vm11, %v1298_v40, %v1300_v39  ;;  %v1301_v43 = vsel %vm828_vm11, %v1296_v41, %v1298_v40 }
 0x404   : > { %v1310_v44 = vsel %vm773_vm9, %v1302_v42, 0  ;;  %v1307_v45 = vsel %vm773_vm9, %v1301_v43, 0  ;;  %v1838_v42 = vld [vmem:[%s2420_s6 + $0x10] sm:$0x3] }
 0x405   : > { %1319 = vmatpush.bf16.msrb.mxu2 %v1307_v45  ;;  %1332 = vmatpush.bf16.msrb.mxu3 %v1310_v44 }
 0x408   : > { %1818 = vmatmul.msk.bf16.vlgmr.msrb.gmra.mxu2 %vm377_vm0, %v1817_v46  ;;  %1819 = vmatmul.msk.bf16.vlgmr.msrb.gmra.mxu3 %vm377_vm0, %v1817_v46 }
 0x409   : > { %v1492_v1 = vpop.permute.xlu2 %1491 }
 0x40a   : > { %v1345_v48 = vpop.permute.xlu1 %1344  ;;  %v1343_v49 = vpop.permute.xlu0 %1342 }
 0x40b   : > { %v1349_v50 = vsel %vm876_vm10, %v1345_v48, %v1347_v21  ;;  %v1348_v51 = vsel %vm876_vm10, %v1343_v49, %v1345_v48 }
 0x40c   : > { %v1357_v52 = vsel %vm773_vm9, %v1349_v50, 0  ;;  %v1354_v23 = vsel %vm773_vm9, %v1348_v51, 0 }
 0x40d   : > { %1366 = vmatpush.bf16.msra.mxu0 %v1354_v23  ;;  %1379 = vmatpush.bf16.msrb.mxu1 %v1357_v52 }
 0x410   : > { %1821 = vmatmul.msk.bf16.vlgmr.msra.gmra.mxu0 %vm377_vm0, %v1820_v53  ;;  %1822 = vmatmul.msk.bf16.vlgmr.msrb.gmra.mxu1 %vm377_vm0, %v1820_v53 }
 0x411   : > { %v1541_v15 = vpop.permute.xlu2 %1540  ;;  %v1262_v43 = vpop.f32.mrf.mxu0 }
 0x412   : > { %v1394_v55 = vpop.permute.xlu1 %1393  ;;  %v1392_v56 = vpop.permute.xlu0 %1391 }
 0x413   : > { %v1398_v57 = vsel %vm926_vm13, %v1394_v55, %v1396_v47  ;;  %v1397_v58 = vsel %vm926_vm13, %v1392_v56, %v1394_v55  ;;  %v1275_v44 = vpop.f32.mrf.mxu1 }
 0x414   : > { %v1406_v59 = vsel %vm773_vm9, %v1398_v57, 0  ;;  %v1403_v61 = vsel %vm773_vm9, %v1397_v58, 0 }
 0x415   : > { %1415 = vmatpush.bf16.msra.mxu2 %v1403_v61  ;;  %1428 = vmatpush.bf16.msra.mxu3 %v1406_v59 }
 0x418   : > { %1824 = vmatmul.msk.bf16.vlgmr.msra.gmra.mxu2 %vm377_vm0, %v1823_v62  ;;  %1825 = vmatmul.msk.bf16.vlgmr.msra.gmra.mxu3 %vm377_vm0, %v1823_v62 }
 0x419   : > { %v1590_v28 = vpop.permute.xlu2 %1589  ;;  %v1264_v45 = vpop.f32.mrf.mxu0 }
 0x41a   : > { %v1443_v63 = vpop.permute.xlu1 %1442  ;;  %v1441_v0 = vpop.permute.xlu0 %1440 }
 0x41b   : > { %v1447_v2 = vsel %vm976_vm12, %v1443_v63, %v1445_v54  ;;  %v1446_v3 = vsel %vm976_vm12, %v1441_v0, %v1443_v63  ;;  %v1277_v46 = vpop.f32.mrf.mxu1 }
 0x41c   : > { %v1455_v4 = vsel %vm773_vm9, %v1447_v2, 0  ;;  %v1452_v5 = vsel %vm773_vm9, %v1446_v3, 0  ;;  %v1280_v2 = vmul.f32 %v2267_v30, %v1275_v44 }
 0x41d   : > { %1464 = vmatpush.bf16.msrb.mxu0 %v1452_v5  ;;  %1477 = vmatpush.bf16.msra.mxu1 %v1455_v4 }
 0x420   : > { %1827 = vmatmul.msk.bf16.vlgmr.msrb.gmra.mxu0 %vm377_vm0, %v1826_v6  ;;  %1828 = vmatmul.msk.bf16.vlgmr.msra.gmra.mxu1 %vm377_vm0, %v1826_v6 }
 0x421   : > { %v1637_v36 = vpop.permute.xlu2 %1636 }
 0x422   : > { %v1490_v8 = vpop.permute.xlu1 %1489  ;;  %v1488_v10 = vpop.permute.xlu0 %1487 }
 0x423   : > { %v1494_v11 = vsel %vm1024_vm15, %v1490_v8, %v1492_v1  ;;  %v1493_v12 = vsel %vm1024_vm15, %v1488_v10, %v1490_v8  ;;  %v1279_v1 = vmul.f32 %v2265_v34, %v1262_v43 }
 0x424   : > { %v1502_v13 = vsel %vm773_vm9, %v1494_v11, 0  ;;  %v1499_v14 = vsel %vm773_vm9, %v1493_v12, 0 }
 0x425   : > { %1511 = vmatpush.bf16.msrb.mxu2 %v1499_v14  ;;  %1524 = vmatpush.bf16.msrb.mxu3 %v1502_v13 }
 0x428   : > { %1830 = vmatmul.msk.bf16.vlgmr.msrb.gmra.mxu2 %vm377_vm0, %v1829_v16  ;;  %1831 = vmatmul.msk.bf16.vlgmr.msrb.gmra.mxu3 %vm377_vm0, %v1829_v16 }
 0x42a   : > { %v1539_v17 = vpop.permute.xlu1 %1538  ;;  %v1537_v19 = vpop.permute.xlu0 %1536 }
 0x42b   : > { %v1543_v22 = vsel %vm1074_vm14, %v1539_v17, %v1541_v15  ;;  %v1542_v24 = vsel %vm1074_vm14, %v1537_v19, %v1539_v17 }
 0x42c   : > { %v1551_v25 = vsel %vm773_vm9, %v1543_v22, 0  ;;  %v1548_v26 = vsel %vm773_vm9, %v1542_v24, 0 }
 0x42d   : > { %1560 = vmatpush.bf16.msra.mxu0 %v1548_v26  ;;  %1573 = vmatpush.bf16.msrb.mxu1 %v1551_v25 }
 0x430   : > { %1833 = vmatmul.msk.bf16.vlgmr.msra.gmra.mxu0 %vm377_vm0, %v1832_v27  ;;  %1834 = vmatmul.msk.bf16.vlgmr.msrb.gmra.mxu1 %vm377_vm0, %v1832_v27 }
 0x432   : > { %v1588_v29 = vpop.permute.xlu1 %1587  ;;  %v1586_v20 = vpop.permute.xlu0 %1585 }
 0x433   : > { %v1592_v31 = vsel %vm1124_vm2, %v1588_v29, %v1590_v28  ;;  %v1591_v32 = vsel %vm1124_vm2, %v1586_v20, %v1588_v29 }
 0x434   : > { %v1600_v33 = vsel %vm773_vm9, %v1592_v31, 0  ;;  %v1597_v9 = vsel %vm773_vm9, %v1591_v32, 0 }
 0x435   : > { %1609 = vmatpush.bf16.msra.mxu2 %v1597_v9  ;;  %1622 = vmatpush.bf16.msra.mxu3 %v1600_v33 }
 0x438   : > { %1836 = vmatmul.msk.bf16.vlgmr.msra.gmra.mxu2 %vm377_vm0, %v1835_v18  ;;  %1837 = vmatmul.msk.bf16.vlgmr.msra.gmra.mxu3 %vm377_vm0, %v1835_v18 }
 0x43a   : > { %v1635_v37 = vpop.permute.xlu1 %1634  ;;  %v1633_v38 = vpop.permute.xlu0 %1632 }
 0x43b   : > { %v1639_v39 = vsel %vm1172_vm1, %v1635_v37, %v1637_v36  ;;  %v1638_v21 = vsel %vm1172_vm1, %v1633_v38, %v1635_v37 }
 0x43c   : > { %v1647_v40 = vsel %vm773_vm9, %v1639_v39, 0  ;;  %v1644_v41 = vsel %vm773_vm9, %v1638_v21, 0 }
 0x43d   : > { %1656 = vmatpush.bf16.msrb.mxu0 %v1644_v41  ;;  %1669 = vmatpush.bf16.msra.mxu1 %v1647_v40 }
 0x440   : > { %1839 = vmatmul.msk.bf16.vlgmr.msrb.gmra.mxu0 %vm377_vm0, %v1838_v42  ;;  %1840 = vmatmul.msk.bf16.vlgmr.msra.gmra.mxu1 %vm377_vm0, %v1838_v42 }
 0x442   : > { %v1683_v41 = vpop.permute.xlu1 %1682 }
 0x48b   : > { %v1321_v47 = vpop.f32.mrf.mxu2  ;;  %v1334_v48 = vpop.f32.mrf.mxu3 }
 0x48c   : > { %v1338_v7 = vadd.f32 %v1321_v47, %v1279_v1  ;;  %v1339_v8 = vadd.f32 %v1334_v48, %v1280_v2 }
 0x48d   : > { %v1368_v49 = vpop.f32.mrf.mxu0  ;;  %v1381_v50 = vpop.f32.mrf.mxu1 }
 0x48e   : > { %v1385_v3 = vmul.f32 %v2269_v60, %v1368_v49  ;;  %v1386_v4 = vmul.f32 %v2272_v35, %v1381_v50 }
 0x490   : > { %v1387_v12 = vadd.f32 %v1385_v3, %v1338_v7  ;;  %v1388_v13 = vadd.f32 %v1386_v4, %v1339_v8 }
 0x493   : > { %v1323_v51 = vpop.f32.mrf.mxu2  ;;  %v1336_v52 = vpop.f32.mrf.mxu3 }
 0x495   : > { %v1370_v23 = vpop.f32.mrf.mxu0  ;;  %v1383_v53 = vpop.f32.mrf.mxu1 }
 0x49b   : > { %v1417_v54 = vpop.f32.mrf.mxu2  ;;  %v1430_v55 = vpop.f32.mrf.mxu3 }
 0x49c   : > { %v1434_v10 = vmul.f32 %v2265_v34, %v1417_v54  ;;  %v1435_v11 = vmul.f32 %v2267_v30, %v1430_v55 }
 0x49d   : > { %v1466_v56 = vpop.f32.mrf.mxu0  ;;  %v1479_v57 = vpop.f32.mrf.mxu1 }
 0x49e   : > { %v1436_v14 = vadd.f32 %v1434_v10, %v1387_v12  ;;  %v1437_v15 = vadd.f32 %v1435_v11, %v1388_v13 }
 0x4a0   : > { %v1483_v26 = vadd.f32 %v1466_v56, %v1436_v14  ;;  %v1484_v27 = vadd.f32 %v1479_v57, %v1437_v15 }
 0x4a3   : > { %v1419_v58 = vpop.f32.mrf.mxu2  ;;  %v1432_v59 = vpop.f32.mrf.mxu3 }
 0x4a5   : > { %v1468_v61 = vpop.f32.mrf.mxu0  ;;  %v1481_v62 = vpop.f32.mrf.mxu1 }
 0x4ab   : > { %v1513_v63 = vpop.f32.mrf.mxu2  ;;  %v1526_v0 = vpop.f32.mrf.mxu3 }
 0x4ac   : > { %v1530_v19 = vmul.f32 %v2269_v60, %v1513_v63  ;;  %v1531_v22 = vmul.f32 %v2272_v35, %v1526_v0 }
 0x4ad   : > { %v1562_v5 = vpop.f32.mrf.mxu0  ;;  %v1575_v6 = vpop.f32.mrf.mxu1 }
 0x4ae   : > { %v1532_v28 = vadd.f32 %v1530_v19, %v1483_v26  ;;  %v1533_v29 = vadd.f32 %v1531_v22, %v1484_v27  ;;  %v1579_v20 = vmul.f32 %v2265_v34, %v1562_v5  ;;  %v1580_v31 = vmul.f32 %v2267_v30, %v1575_v6 }
 0x4b0   : > { %v1581_v9 = vadd.f32 %v1579_v20, %v1532_v28  ;;  %v1582_v18 = vadd.f32 %v1580_v31, %v1533_v29 }
 0x4b3   : > { %v1515_v16 = vpop.f32.mrf.mxu2  ;;  %v1528_v17 = vpop.f32.mrf.mxu3 }
 0x4b5   : > { %v1564_v24 = vpop.f32.mrf.mxu0  ;;  %v1577_v25 = vpop.f32.mrf.mxu1 }
 0x4bb   : > { %v1611_v32 = vpop.f32.mrf.mxu2  ;;  %v1624_v33 = vpop.f32.mrf.mxu3 }
 0x4bc   : > { %v1628_v38 = vadd.f32 %v1611_v32, %v1581_v9  ;;  %v1629_v39 = vadd.f32 %v1624_v33, %v1582_v18 }
 0x4bd   : > { %v1658_v36 = vpop.f32.mrf.mxu0  ;;  %v1671_v37 = vpop.f32.mrf.mxu1 }
 0x4be   : > { %v1675_v21 = vmul.f32 %v2269_v60, %v1658_v36  ;;  %v1676_v40 = vmul.f32 %v2272_v35, %v1671_v37 }
 0x4c0   : > { %v1677_v42 = vadd.f32 %v1675_v21, %v1628_v38  ;;  %v1678_v43 = vadd.f32 %v1676_v40, %v1629_v39 }
 0x4c2   : > { %v1685_v44 = vadd.f32 %v1683_v41, %v1677_v42  ;;  %v1686_v34 = vadd.f32 %v1683_v41, %v1678_v43 }
 0x4c3   : > { %v1626_v30 = vpop.f32.mrf.mxu3  ;;  %v1613_v45 = vpop.f32.mrf.mxu2 }
 0x4c4   : > { %v1688_v46 = vmax.f32 %v1686_v34, 0.0  ;;  %v1687_v49 = vmax.f32 %v1685_v44, 0.0 }
 0x4c5   : > { %v1673_v47 = vpop.f32.mrf.mxu1  ;;  %v1660_v48 = vpop.f32.mrf.mxu0 }
 0x4c6   : > { %v1691_v50 = vrot.slane %v1688_v46, 4 }
 0x4c8   : > { %v1692_v60 = vsel %vm773_vm9, %v1687_v49, %v1691_v50 }
 0x4c9   : > { %1694 = vst [vmem:[%s325_s11] sm:$0xff] %v1692_v60 }
 0x4ca PF: > { %s18_s27 = sadd.s32 1, %s1883_s27  }
 0x4cb   : > { %p15_p4 = scmp.ge.s32.totalorder %s18_s27, 4  }
 0x4cd   :  { %17 = sbr.rel (!%p15_p4) target bundleno = 1 (0x1), region = 101 }

</bundles_post_ra>
